<compile_context>
chip_gen: v6e
topology: v6e:2x2x1
jax: 0.10.0
libtpu: 0.0.40
codegen_flags: <defaults>
</compile_context>

<pallas_src>
import numpy as np
import jax
import jax.numpy as jnp
from jax.experimental import pallas as pl
from jax.experimental.pallas import tpu as pltpu


# ----------------------------- Pallas kernel ------------------------------ #
def lstm_tagger_kernel(
    cx_ref,      # (Tc*S, Ec)   char embeddings, time-major
    cm_ref,      # (Tc*S, 1)    char validity mask
    wx_ref,      # (S, Ew)      word embeddings
    wc_ih_ref,   # (Ec, 4*Hcp)  char LSTM input weights
    wc_hh_ref,   # (Hcp, 4*Hcp) char LSTM recurrent weights
    bc_ref,      # (1, 4*Hcp)
    wwi_w_ref,   # (Ew, 4*Hwp)  word LSTM input weights (word-embedding part)
    wwi_c_ref,   # (Hcp, 4*Hwp) word LSTM input weights (char-hidden part)
    ww_hh_ref,   # (Hwp, 4*Hwp) word LSTM recurrent weights
    bw_ref,      # (1, 4*Hwp)
    wt_ref,      # (Hwp, Tp)    hidden2tag
    bt_ref,      # (1, Tp)      (padded tag columns carry -1e30 so softmax ignores them)
    out_ref,     # (S, Tp)      log-softmax scores
    wouts_ref,   # scratch (S, Hwp) word-LSTM outputs
):
    S, _ = wx_ref.shape
    Tc = cx_ref.shape[0] // S
    Hcp = wc_hh_ref.shape[0]
    Hwp = ww_hh_ref.shape[0]

    # ---- char LSTM: hoisted input projection (ONE matmul for all time steps) ----
    xg_c = (
        jnp.dot(cx_ref[...], wc_ih_ref[...], preferred_element_type=jnp.float32)
        + bc_ref[...]
    )                                            # (Tc*S, 4*Hcp)
    keep = cm_ref[...] != 0.0                    # (Tc*S, 1) bool
    wc_hh = wc_hh_ref[...]

    h = jnp.zeros((S, Hcp), jnp.float32)
    c = jnp.zeros((S, Hcp), jnp.float32)
    for t in range(Tc):                          # fully unrolled (static trip count)
        g = xg_c[t * S:(t + 1) * S, :] + jnp.dot(
            h, wc_hh, preferred_element_type=jnp.float32)
        ig = jax.nn.sigmoid(g[:, 0 * Hcp:1 * Hcp])
        fg = jax.nn.sigmoid(g[:, 1 * Hcp:2 * Hcp])
        gg = jnp.tanh(g[:, 2 * Hcp:3 * Hcp])
        og = jax.nn.sigmoid(g[:, 3 * Hcp:4 * Hcp])
        c_new = fg * c + ig * gg
        h_new = og * jnp.tanh(c_new)
        m = keep[t * S:(t + 1) * S, :]           # (S, 1)
        h = jnp.where(m, h_new, h)               # freeze past each word's last char
        c = jnp.where(m, c_new, c)
    h_char = h                                   # (S, Hcp)

    # ---- word LSTM: concat eliminated via split W_ih; input projection hoisted ----
    xg_w = (
        jnp.dot(wx_ref[...], wwi_w_ref[...], preferred_element_type=jnp.float32)
        + jnp.dot(h_char, wwi_c_ref[...], preferred_element_type=jnp.float32)
        + bw_ref[...]
    )                                            # (S, 4*Hwp)
    ww_hh = ww_hh_ref[...]

    hw = jnp.zeros((1, Hwp), jnp.float32)
    cw = jnp.zeros((1, Hwp), jnp.float32)
    for s in range(S):                           # fully unrolled sequential sentence scan
        g = xg_w[s:s + 1, :] + jnp.dot(
            hw, ww_hh, preferred_element_type=jnp.float32)
        ig = jax.nn.sigmoid(g[:, 0 * Hwp:1 * Hwp])
        fg = jax.nn.sigmoid(g[:, 1 * Hwp:2 * Hwp])
        gg = jnp.tanh(g[:, 2 * Hwp:3 * Hwp])
        og = jax.nn.sigmoid(g[:, 3 * Hwp:4 * Hwp])
        cw = fg * cw + ig * gg
        hw = og * jnp.tanh(cw)
        wouts_ref[pl.ds(s, 1), :] = hw

    # ---- hidden2tag + log_softmax over the (lane-dense, padded) tag axis ----
    tag_space = (
        jnp.dot(wouts_ref[...], wt_ref[...], preferred_element_type=jnp.float32)
        + bt_ref[...]
    )                                            # padded tags sit at -1e30 -> exp == 0
    mx = jnp.max(tag_space, axis=-1, keepdims=True)
    shifted = tag_space - mx
    lse = jnp.log(jnp.sum(jnp.exp(shifted), axis=-1, keepdims=True))
    out_ref[...] = shifted - lse


# ------------------------------ wrapper ----------------------------------- #
def lstm_tagger_forward(char_x, char_mask, word_x, kparams, tagset_size):
    B, TcS, Ec = char_x.shape
    _, S, Ew = word_x.shape
    Hcp = kparams["wc_hh"].shape[0]
    Hwp = kparams["ww_hh"].shape[0]
    Tp = kparams["wt"].shape[1]

    def batched(shape):                 # one sentence per grid step (batch dim squeezed)
        nz = (0,) * len(shape)
        return pl.BlockSpec((None,) + shape, lambda b: (b,) + nz)

    def shared(shape):                  # weights: resident, same block every grid step
        nz = (0,) * len(shape)
        return pl.BlockSpec(shape, lambda b: nz)

    call = pl.pallas_call(
        lstm_tagger_kernel,
        out_shape=jax.ShapeDtypeStruct((B, S, Tp), jnp.float32),
        grid=(B,),
        in_specs=[
            batched((TcS, Ec)),                  # char_x
            batched((TcS, 1)),                   # char_mask
            batched((S, Ew)),                    # word_x
            shared((Ec, 4 * Hcp)),               # wc_ih
            shared((Hcp, 4 * Hcp)),              # wc_hh
            shared((1, 4 * Hcp)),                # bc
            shared((Ew, 4 * Hwp)),               # ww_ih (word part)
            shared((Hcp, 4 * Hwp)),              # ww_ih (char-hidden part)
            shared((Hwp, 4 * Hwp)),              # ww_hh
            shared((1, 4 * Hwp)),                # bw
            shared((Hwp, Tp)),                   # wt
            shared((1, Tp)),                     # bt
        ],
        out_specs=batched((S, Tp)),
        scratch_shapes=[pltpu.VMEM((S, Hwp), jnp.float32)],
        compiler_params=pltpu.CompilerParams(
            dimension_semantics=("parallel",),   # shard sentences across TCs on v7x
        ),
    )
    out = call(
        char_x, char_mask, word_x,
        kparams["wc_ih"], kparams["wc_hh"], kparams["bc"],
        kparams["wwi_w"], kparams["wwi_c"], kparams["ww_hh"], kparams["bw"],
        kparams["wt"], kparams["bt"],
    )
    return out[..., :tagset_size]


# -------------------------- weight padding helpers -------------------------- #
def _pad_gate_cols(w, H, Hp):
    """(..., 4*H) gate-ordered [i,f,g,o] -> (..., 4*Hp), each gate zero-padded."""
    if H == Hp:
        return w
    parts = jnp.split(w, 4, axis=-1)
    pad = [(0, 0)] * (w.ndim - 1) + [(0, Hp - H)]
    return jnp.concatenate([jnp.pad(p, pad) for p in parts], axis=-1)


def _pad_rows(w, H, Hp):
    if H == Hp:
        return w
    return jnp.pad(w, [(0, Hp - H)] + [(0, 0)] * (w.ndim - 1))


# -------------------------- pure-JAX reference ----------------------------- #
def _lstm_cell_ref(x, h, c, w_ih, w_hh, b):
    H = h.shape[-1]
    gates = x @ w_ih + h @ w_hh + b
    i = jax.nn.sigmoid(gates[..., 0:H])
    f = jax.nn.sigmoid(gates[..., H:2 * H])
    g = jnp.tanh(gates[..., 2 * H:3 * H])
    o = jax.nn.sigmoid(gates[..., 3 * H:4 * H])
    c = f * c + i * g
    h = o * jnp.tanh(c)
    return h, c


def reference_forward(sentence_words, word_to_ix, char_to_ix,
                      word_emb, char_emb, p):
    Hc = p["wc_hh"].shape[0]
    Hw = p["ww_hh"].shape[0]
    z_list = []
    for w in sentence_words:
        we = word_emb[word_to_ix[w]]
        h = jnp.zeros((Hc,), jnp.float32)
        c = jnp.zeros((Hc,), jnp.float32)
        for ch in w:
            x = char_emb[char_to_ix[ch]]
            h, c = _lstm_cell_ref(x, h, c, p["wc_ih"], p["wc_hh"], p["bc"])
        z_list.append(jnp.concatenate([we, h], axis=-1))
    hw = jnp.zeros((Hw,), jnp.float32)
    cw = jnp.zeros((Hw,), jnp.float32)
    outs = []
    for z in z_list:
        hw, cw = _lstm_cell_ref(z, hw, cw, p["ww_ih"], p["ww_hh"], p["bw"])
        outs.append(hw)
    lstm_outs = jnp.stack(outs, axis=0)
    tag_space = lstm_outs @ p["wt"] + p["bt"]
    return jax.nn.log_softmax(tag_space, axis=1)


# --------------------------------- main ------------------------------------ #
if __name__ == "__main__":
    # vocab / char maps built in-script (replaces the module's globals)
    training_words = ["the", "dog", "ate", "apple", "everybody", "read", "that", "book"]
    word_to_ix = {w: i for i, w in enumerate(training_words)}
    chars = sorted(set("".join(training_words)))
    char_to_ix = {c: i for i, c in enumerate(chars)}

    # a small batch of sentences (independent forward passes of the module)
    sentences = [
        ["the", "dog", "ate", "the", "apple"],
        ["everybody", "read", "that", "book"],
    ]

    # model dimensions
    Ew, Hw = 16, 32          # word embedding / hidden dim
    Ec, Hc = 8, 16           # char embedding / hidden dim
    vocab_size = len(word_to_ix)
    char_size = len(char_to_ix)
    tagset_size = 4

    # lane-friendly padded dims (4*H multiple of 128 lanes; tag axis lane-dense)
    def ceil_to(x, m):
        return ((x + m - 1) // m) * m
    Hcp = ceil_to(Hc, 32)
    Hwp = ceil_to(Hw, 32)
    Tp = ceil_to(tagset_size, 128)

    # deterministic parameter init (PyTorch-style uniform(-1/sqrt(H), 1/sqrt(H)))
    key = jax.random.PRNGKey(0)
    ks = jax.random.split(key, 16)

    def uni(k, shape, bound):
        return jax.random.uniform(k, shape, jnp.float32, -bound, bound)

    word_emb = jax.random.normal(ks[0], (vocab_size, Ew), jnp.float32)
    char_emb = jax.random.normal(ks[1], (char_size, Ec), jnp.float32)

    kc = 1.0 / np.sqrt(Hc)
    kw = 1.0 / np.sqrt(Hw)

    # nn.LSTM weights: (4H, in) / (4H, H), gate order [i,f,g,o]; biases summed
    wc_ih = uni(ks[2], (4 * Hc, Ec), kc)
    wc_hh = uni(ks[3], (4 * Hc, Hc), kc)
    bc = uni(ks[4], (4 * Hc,), kc) + uni(ks[5], (4 * Hc,), kc)
    ww_ih = uni(ks[6], (4 * Hw, Ew + Hc), kw)
    ww_hh = uni(ks[7], (4 * Hw, Hw), kw)
    bw = uni(ks[8], (4 * Hw,), kw) + uni(ks[9], (4 * Hw,), kw)
    wt = uni(ks[10], (tagset_size, Hw), kw)      # nn.Linear weight (out, in)
    bt = uni(ks[11], (tagset_size,), kw)

    # kernel-side params: transposed, gate-padded (padded hidden units provably stay 0),
    # word-LSTM input weight split into (word-embedding, char-hidden) parts.
    wc_ih_t, wc_hh_t = wc_ih.T, wc_hh.T
    ww_ih_t, ww_hh_t = ww_ih.T, ww_hh.T
    kparams = {
        "wc_ih": _pad_gate_cols(wc_ih_t, Hc, Hcp),
        "wc_hh": _pad_gate_cols(_pad_rows(wc_hh_t, Hc, Hcp), Hc, Hcp),
        "bc": _pad_gate_cols(bc[None, :], Hc, Hcp),
        "wwi_w": _pad_gate_cols(ww_ih_t[:Ew], Hw, Hwp),
        "wwi_c": _pad_gate_cols(_pad_rows(ww_ih_t[Ew:], Hc, Hcp), Hw, Hwp),
        "ww_hh": _pad_gate_cols(_pad_rows(ww_hh_t, Hw, Hwp), Hw, Hwp),
        "bw": _pad_gate_cols(bw[None, :], Hw, Hwp),
        "wt": jnp.pad(_pad_rows(wt.T, Hw, Hwp), [(0, 0), (0, Tp - tagset_size)]),
        "bt": jnp.pad(bt[None, :], [(0, 0), (0, Tp - tagset_size)],
                      constant_values=-1e30),    # padded tag logits -> exp == 0
    }

    # ---- build kernel inputs (string->idx + embedding gathers = glue in numpy/JAX) ----
    B = len(sentences)
    S_pad = 8                                    # sublane-friendly sentence pad
    Tc = max(len(w) for s in sentences for w in s)

    word_ids = np.zeros((B, S_pad), np.int32)
    char_ids = np.zeros((B, Tc, S_pad), np.int32)
    cmask = np.zeros((B, Tc, S_pad), np.float32)
    for b, sent in enumerate(sentences):
        for si, w in enumerate(sent):
            word_ids[b, si] = word_to_ix[w]
            for t, ch in enumerate(w):
                char_ids[b, t, si] = char_to_ix[ch]
                cmask[b, t, si] = 1.0

    word_x = word_emb[jnp.asarray(word_ids)].astype(jnp.float32)        # (B, S_pad, Ew)
    char_x = char_emb[jnp.asarray(char_ids)].astype(jnp.float32)        # (B, Tc, S_pad, Ec)
    char_x = char_x.reshape(B, Tc * S_pad, Ec)                          # time-major rows
    char_mask = jnp.asarray(cmask).reshape(B, Tc * S_pad, 1)

    # ---- run Pallas kernel ----
    tag_scores = lstm_tagger_forward(char_x, char_mask, word_x, kparams, tagset_size)
    tag_scores = jax.block_until_ready(tag_scores)                      # (B, S_pad, T)

    # ---- verify against pure-JAX reference of the PyTorch semantics ----
    ref_params = {"wc_ih": wc_ih_t, "wc_hh": wc_hh_t, "bc": bc,
                  "ww_ih": ww_ih_t, "ww_hh": ww_hh_t, "bw": bw,
                  "wt": wt.T, "bt": bt}
    for b, sent in enumerate(sentences):
        ref = reference_forward(sent, word_to_ix, char_to_ix,
                                word_emb, char_emb, ref_params)
        np.testing.assert_allclose(np.asarray(tag_scores[b, :len(sent), :]),
                                   np.asarray(ref), rtol=1e-4, atol=1e-4)

    print("KERNEL_OK")
</pallas_src>

<mosaic_0001>
module attributes {stable_mosaic.version = 11 : i64} {
  func.func @lstm_tagger_kernel(%arg0: i32, %arg1: memref<1x72x8xf32, #tpu.memory_space<vmem>>, %arg2: memref<1x72x1xf32, #tpu.memory_space<vmem>>, %arg3: memref<1x8x16xf32, #tpu.memory_space<vmem>>, %arg4: memref<8x128xf32, #tpu.memory_space<vmem>>, %arg5: memref<32x128xf32, #tpu.memory_space<vmem>>, %arg6: memref<1x128xf32, #tpu.memory_space<vmem>>, %arg7: memref<16x128xf32, #tpu.memory_space<vmem>>, %arg8: memref<32x128xf32, #tpu.memory_space<vmem>>, %arg9: memref<32x128xf32, #tpu.memory_space<vmem>>, %arg10: memref<1x128xf32, #tpu.memory_space<vmem>>, %arg11: memref<32x128xf32, #tpu.memory_space<vmem>>, %arg12: memref<1x128xf32, #tpu.memory_space<vmem>>, %arg13: memref<1x8x128xf32, #tpu.memory_space<vmem>>, %arg14: memref<8x32xf32, #tpu.memory_space<vmem>>) attributes {dimension_semantics = [#tpu.dimension_semantics<parallel>], iteration_bounds = array<i64: 2>, scalar_prefetch = 0 : i64, scratch_operands = 1 : i64, tpu.core_type = #tpu.core_type<tc>, window_params = [{transform_indices = @transform_0, window_bounds = array<i64: 1, 72, 8>}, {transform_indices = @transform_1, window_bounds = array<i64: 1, 72, 1>}, {transform_indices = @transform_2, window_bounds = array<i64: 1, 8, 16>}, {pipeline_mode = #tpu.pipeline_mode<synchronous>, transform_indices = @transform_3, window_bounds = array<i64: 8, 128>}, {pipeline_mode = #tpu.pipeline_mode<synchronous>, transform_indices = @transform_4, window_bounds = array<i64: 32, 128>}, {pipeline_mode = #tpu.pipeline_mode<synchronous>, transform_indices = @transform_5, window_bounds = array<i64: 1, 128>}, {pipeline_mode = #tpu.pipeline_mode<synchronous>, transform_indices = @transform_6, window_bounds = array<i64: 16, 128>}, {pipeline_mode = #tpu.pipeline_mode<synchronous>, transform_indices = @transform_7, window_bounds = array<i64: 32, 128>}, {pipeline_mode = #tpu.pipeline_mode<synchronous>, transform_indices = @transform_8, window_bounds = array<i64: 32, 128>}, {pipeline_mode = #tpu.pipeline_mode<synchronous>, transform_indices = @transform_9, window_bounds = array<i64: 1, 128>}, {pipeline_mode = #tpu.pipeline_mode<synchronous>, transform_indices = @transform_10, window_bounds = array<i64: 32, 128>}, {pipeline_mode = #tpu.pipeline_mode<synchronous>, transform_indices = @transform_11, window_bounds = array<i64: 1, 128>}, {transform_indices = @transform_12, window_bounds = array<i64: 1, 8, 128>}]} {
    %c0 = arith.constant 0 : index
    %c0_0 = arith.constant 0 : index
    %c0_1 = arith.constant 0 : index
    %0 = vector.load %arg1[%c0, %c0_0, %c0_1] : memref<1x72x8xf32, #tpu.memory_space<vmem>>, vector<1x72x8xf32>
    %1 = vector.shape_cast %0 : vector<1x72x8xf32> to vector<72x8xf32>
    %c0_2 = arith.constant 0 : index
    %c0_3 = arith.constant 0 : index
    %2 = vector.load %arg4[%c0_2, %c0_3] : memref<8x128xf32, #tpu.memory_space<vmem>>, vector<8x128xf32>
    %cst = arith.constant dense<0.000000e+00> : vector<72x128xf32>
    %3 = tpu.matmul %1, %2, %cst {dimension_numbers = #tpu.dot_dimension_numbers<[1], [0], [0], [1], [0, 0, 1, 1], [], []>} : vector<72x8xf32>, vector<8x128xf32>, vector<72x128xf32> -> vector<72x128xf32>
    %c0_4 = arith.constant 0 : index
    %c0_5 = arith.constant 0 : index
    %4 = vector.load %arg6[%c0_4, %c0_5] : memref<1x128xf32, #tpu.memory_space<vmem>>, vector<1x128xf32>
    %5 = vector.broadcast %4 : vector<1x128xf32> to vector<72x128xf32>
    %6 = arith.addf %3, %5 : vector<72x128xf32>
    %c0_6 = arith.constant 0 : index
    %c0_7 = arith.constant 0 : index
    %c0_8 = arith.constant 0 : index
    %7 = vector.load %arg2[%c0_6, %c0_7, %c0_8] : memref<1x72x1xf32, #tpu.memory_space<vmem>>, vector<1x72x1xf32>
    %8 = vector.shape_cast %7 : vector<1x72x1xf32> to vector<72x1xf32>
    %cst_9 = arith.constant 0.000000e+00 : f32
    %9 = vector.broadcast %cst_9 : f32 to vector<72x1xf32>
    %10 = arith.cmpf one, %8, %9 : vector<72x1xf32>
    %c0_10 = arith.constant 0 : index
    %c0_11 = arith.constant 0 : index
    %11 = vector.load %arg5[%c0_10, %c0_11] : memref<32x128xf32, #tpu.memory_space<vmem>>, vector<32x128xf32>
    %cst_12 = arith.constant 0.000000e+00 : f32
    %12 = vector.broadcast %cst_12 : f32 to vector<8x32xf32>
    %cst_13 = arith.constant 0.000000e+00 : f32
    %13 = vector.broadcast %cst_13 : f32 to vector<8x32xf32>
    %14 = vector.extract_strided_slice %6 {offsets = [0, 0], sizes = [8, 128], strides = [1, 1]} : vector<72x128xf32> to vector<8x128xf32>
    %cst_14 = arith.constant dense<0.000000e+00> : vector<8x128xf32>
    %15 = tpu.matmul %12, %11, %cst_14 {dimension_numbers = #tpu.dot_dimension_numbers<[1], [0], [0], [1], [0, 0, 1, 1], [], []>} : vector<8x32xf32>, vector<32x128xf32>, vector<8x128xf32> -> vector<8x128xf32>
    %16 = arith.addf %14, %15 : vector<8x128xf32>
    %17 = vector.extract_strided_slice %16 {offsets = [0, 0], sizes = [8, 32], strides = [1, 1]} : vector<8x128xf32> to vector<8x32xf32>
    %18 = arith.negf %17 : vector<8x32xf32>
    %19 = math.exp %18 : vector<8x32xf32>
    %cst_15 = arith.constant 1.000000e+00 : f32
    %20 = vector.broadcast %cst_15 : f32 to vector<8x32xf32>
    %21 = arith.addf %20, %19 : vector<8x32xf32>
    %22 = arith.divf %20, %21 : vector<8x32xf32>
    %23 = vector.extract_strided_slice %16 {offsets = [0, 32], sizes = [8, 32], strides = [1, 1]} : vector<8x128xf32> to vector<8x32xf32>
    %24 = arith.negf %23 : vector<8x32xf32>
    %25 = math.exp %24 : vector<8x32xf32>
    %cst_16 = arith.constant 1.000000e+00 : f32
    %26 = vector.broadcast %cst_16 : f32 to vector<8x32xf32>
    %27 = arith.addf %26, %25 : vector<8x32xf32>
    %28 = arith.divf %26, %27 : vector<8x32xf32>
    %29 = vector.extract_strided_slice %16 {offsets = [0, 64], sizes = [8, 32], strides = [1, 1]} : vector<8x128xf32> to vector<8x32xf32>
    %30 = math.tanh %29 : vector<8x32xf32>
    %31 = vector.extract_strided_slice %16 {offsets = [0, 96], sizes = [8, 32], strides = [1, 1]} : vector<8x128xf32> to vector<8x32xf32>
    %32 = arith.negf %31 : vector<8x32xf32>
    %33 = math.exp %32 : vector<8x32xf32>
    %cst_17 = arith.constant 1.000000e+00 : f32
    %34 = vector.broadcast %cst_17 : f32 to vector<8x32xf32>
    %35 = arith.addf %34, %33 : vector<8x32xf32>
    %36 = arith.divf %34, %35 : vector<8x32xf32>
    %37 = arith.mulf %28, %13 : vector<8x32xf32>
    %38 = arith.mulf %22, %30 : vector<8x32xf32>
    %39 = arith.addf %37, %38 : vector<8x32xf32>
    %40 = math.tanh %39 : vector<8x32xf32>
    %41 = arith.mulf %36, %40 : vector<8x32xf32>
    %42 = vector.extract_strided_slice %10 {offsets = [0, 0], sizes = [8, 1], strides = [1, 1]} : vector<72x1xi1> to vector<8x1xi1>
    %43 = vector.shape_cast %42 : vector<8x1xi1> to vector<8x1xi1>
    %44 = vector.broadcast %43 : vector<8x1xi1> to vector<8x32xi1>
    %45 = arith.select %44, %41, %12 : vector<8x32xi1>, vector<8x32xf32>
    %46 = vector.shape_cast %42 : vector<8x1xi1> to vector<8x1xi1>
    %47 = vector.broadcast %46 : vector<8x1xi1> to vector<8x32xi1>
    %48 = arith.select %47, %39, %13 : vector<8x32xi1>, vector<8x32xf32>
    %49 = vector.extract_strided_slice %6 {offsets = [8, 0], sizes = [8, 128], strides = [1, 1]} : vector<72x128xf32> to vector<8x128xf32>
    %cst_18 = arith.constant dense<0.000000e+00> : vector<8x128xf32>
    %50 = tpu.matmul %45, %11, %cst_18 {dimension_numbers = #tpu.dot_dimension_numbers<[1], [0], [0], [1], [0, 0, 1, 1], [], []>} : vector<8x32xf32>, vector<32x128xf32>, vector<8x128xf32> -> vector<8x128xf32>
    %51 = arith.addf %49, %50 : vector<8x128xf32>
    %52 = vector.extract_strided_slice %51 {offsets = [0, 0], sizes = [8, 32], strides = [1, 1]} : vector<8x128xf32> to vector<8x32xf32>
    %53 = arith.negf %52 : vector<8x32xf32>
    %54 = math.exp %53 : vector<8x32xf32>
    %cst_19 = arith.constant 1.000000e+00 : f32
    %55 = vector.broadcast %cst_19 : f32 to vector<8x32xf32>
    %56 = arith.addf %55, %54 : vector<8x32xf32>
    %57 = arith.divf %55, %56 : vector<8x32xf32>
    %58 = vector.extract_strided_slice %51 {offsets = [0, 32], sizes = [8, 32], strides = [1, 1]} : vector<8x128xf32> to vector<8x32xf32>
    %59 = arith.negf %58 : vector<8x32xf32>
    %60 = math.exp %59 : vector<8x32xf32>
    %cst_20 = arith.constant 1.000000e+00 : f32
    %61 = vector.broadcast %cst_20 : f32 to vector<8x32xf32>
    %62 = arith.addf %61, %60 : vector<8x32xf32>
    %63 = arith.divf %61, %62 : vector<8x32xf32>
    %64 = vector.extract_strided_slice %51 {offsets = [0, 64], sizes = [8, 32], strides = [1, 1]} : vector<8x128xf32> to vector<8x32xf32>
    %65 = math.tanh %64 : vector<8x32xf32>
    %66 = vector.extract_strided_slice %51 {offsets = [0, 96], sizes = [8, 32], strides = [1, 1]} : vector<8x128xf32> to vector<8x32xf32>
    %67 = arith.negf %66 : vector<8x32xf32>
    %68 = math.exp %67 : vector<8x32xf32>
    %cst_21 = arith.constant 1.000000e+00 : f32
    %69 = vector.broadcast %cst_21 : f32 to vector<8x32xf32>
    %70 = arith.addf %69, %68 : vector<8x32xf32>
    %71 = arith.divf %69, %70 : vector<8x32xf32>
    %72 = arith.mulf %63, %48 : vector<8x32xf32>
    %73 = arith.mulf %57, %65 : vector<8x32xf32>
    %74 = arith.addf %72, %73 : vector<8x32xf32>
    %75 = math.tanh %74 : vector<8x32xf32>
    %76 = arith.mulf %71, %75 : vector<8x32xf32>
    %77 = vector.extract_strided_slice %10 {offsets = [8, 0], sizes = [8, 1], strides = [1, 1]} : vector<72x1xi1> to vector<8x1xi1>
    %78 = vector.shape_cast %77 : vector<8x1xi1> to vector<8x1xi1>
    %79 = vector.broadcast %78 : vector<8x1xi1> to vector<8x32xi1>
    %80 = arith.select %79, %76, %45 : vector<8x32xi1>, vector<8x32xf32>
    %81 = vector.shape_cast %77 : vector<8x1xi1> to vector<8x1xi1>
    %82 = vector.broadcast %81 : vector<8x1xi1> to vector<8x32xi1>
    %83 = arith.select %82, %74, %48 : vector<8x32xi1>, vector<8x32xf32>
    %84 = vector.extract_strided_slice %6 {offsets = [16, 0], sizes = [8, 128], strides = [1, 1]} : vector<72x128xf32> to vector<8x128xf32>
    %cst_22 = arith.constant dense<0.000000e+00> : vector<8x128xf32>
    %85 = tpu.matmul %80, %11, %cst_22 {dimension_numbers = #tpu.dot_dimension_numbers<[1], [0], [0], [1], [0, 0, 1, 1], [], []>} : vector<8x32xf32>, vector<32x128xf32>, vector<8x128xf32> -> vector<8x128xf32>
    %86 = arith.addf %84, %85 : vector<8x128xf32>
    %87 = vector.extract_strided_slice %86 {offsets = [0, 0], sizes = [8, 32], strides = [1, 1]} : vector<8x128xf32> to vector<8x32xf32>
    %88 = arith.negf %87 : vector<8x32xf32>
    %89 = math.exp %88 : vector<8x32xf32>
    %cst_23 = arith.constant 1.000000e+00 : f32
    %90 = vector.broadcast %cst_23 : f32 to vector<8x32xf32>
    %91 = arith.addf %90, %89 : vector<8x32xf32>
    %92 = arith.divf %90, %91 : vector<8x32xf32>
    %93 = vector.extract_strided_slice %86 {offsets = [0, 32], sizes = [8, 32], strides = [1, 1]} : vector<8x128xf32> to vector<8x32xf32>
    %94 = arith.negf %93 : vector<8x32xf32>
    %95 = math.exp %94 : vector<8x32xf32>
    %cst_24 = arith.constant 1.000000e+00 : f32
    %96 = vector.broadcast %cst_24 : f32 to vector<8x32xf32>
    %97 = arith.addf %96, %95 : vector<8x32xf32>
    %98 = arith.divf %96, %97 : vector<8x32xf32>
    %99 = vector.extract_strided_slice %86 {offsets = [0, 64], sizes = [8, 32], strides = [1, 1]} : vector<8x128xf32> to vector<8x32xf32>
    %100 = math.tanh %99 : vector<8x32xf32>
    %101 = vector.extract_strided_slice %86 {offsets = [0, 96], sizes = [8, 32], strides = [1, 1]} : vector<8x128xf32> to vector<8x32xf32>
    %102 = arith.negf %101 : vector<8x32xf32>
    %103 = math.exp %102 : vector<8x32xf32>
    %cst_25 = arith.constant 1.000000e+00 : f32
    %104 = vector.broadcast %cst_25 : f32 to vector<8x32xf32>
    %105 = arith.addf %104, %103 : vector<8x32xf32>
    %106 = arith.divf %104, %105 : vector<8x32xf32>
    %107 = arith.mulf %98, %83 : vector<8x32xf32>
    %108 = arith.mulf %92, %100 : vector<8x32xf32>
    %109 = arith.addf %107, %108 : vector<8x32xf32>
    %110 = math.tanh %109 : vector<8x32xf32>
    %111 = arith.mulf %106, %110 : vector<8x32xf32>
    %112 = vector.extract_strided_slice %10 {offsets = [16, 0], sizes = [8, 1], strides = [1, 1]} : vector<72x1xi1> to vector<8x1xi1>
    %113 = vector.shape_cast %112 : vector<8x1xi1> to vector<8x1xi1>
    %114 = vector.broadcast %113 : vector<8x1xi1> to vector<8x32xi1>
    %115 = arith.select %114, %111, %80 : vector<8x32xi1>, vector<8x32xf32>
    %116 = vector.shape_cast %112 : vector<8x1xi1> to vector<8x1xi1>
    %117 = vector.broadcast %116 : vector<8x1xi1> to vector<8x32xi1>
    %118 = arith.select %117, %109, %83 : vector<8x32xi1>, vector<8x32xf32>
    %119 = vector.extract_strided_slice %6 {offsets = [24, 0], sizes = [8, 128], strides = [1, 1]} : vector<72x128xf32> to vector<8x128xf32>
    %cst_26 = arith.constant dense<0.000000e+00> : vector<8x128xf32>
    %120 = tpu.matmul %115, %11, %cst_26 {dimension_numbers = #tpu.dot_dimension_numbers<[1], [0], [0], [1], [0, 0, 1, 1], [], []>} : vector<8x32xf32>, vector<32x128xf32>, vector<8x128xf32> -> vector<8x128xf32>
    %121 = arith.addf %119, %120 : vector<8x128xf32>
    %122 = vector.extract_strided_slice %121 {offsets = [0, 0], sizes = [8, 32], strides = [1, 1]} : vector<8x128xf32> to vector<8x32xf32>
    %123 = arith.negf %122 : vector<8x32xf32>
    %124 = math.exp %123 : vector<8x32xf32>
    %cst_27 = arith.constant 1.000000e+00 : f32
    %125 = vector.broadcast %cst_27 : f32 to vector<8x32xf32>
    %126 = arith.addf %125, %124 : vector<8x32xf32>
    %127 = arith.divf %125, %126 : vector<8x32xf32>
    %128 = vector.extract_strided_slice %121 {offsets = [0, 32], sizes = [8, 32], strides = [1, 1]} : vector<8x128xf32> to vector<8x32xf32>
    %129 = arith.negf %128 : vector<8x32xf32>
    %130 = math.exp %129 : vector<8x32xf32>
    %cst_28 = arith.constant 1.000000e+00 : f32
    %131 = vector.broadcast %cst_28 : f32 to vector<8x32xf32>
    %132 = arith.addf %131, %130 : vector<8x32xf32>
    %133 = arith.divf %131, %132 : vector<8x32xf32>
    %134 = vector.extract_strided_slice %121 {offsets = [0, 64], sizes = [8, 32], strides = [1, 1]} : vector<8x128xf32> to vector<8x32xf32>
    %135 = math.tanh %134 : vector<8x32xf32>
    %136 = vector.extract_strided_slice %121 {offsets = [0, 96], sizes = [8, 32], strides = [1, 1]} : vector<8x128xf32> to vector<8x32xf32>
    %137 = arith.negf %136 : vector<8x32xf32>
    %138 = math.exp %137 : vector<8x32xf32>
    %cst_29 = arith.constant 1.000000e+00 : f32
    %139 = vector.broadcast %cst_29 : f32 to vector<8x32xf32>
    %140 = arith.addf %139, %138 : vector<8x32xf32>
    %141 = arith.divf %139, %140 : vector<8x32xf32>
    %142 = arith.mulf %133, %118 : vector<8x32xf32>
    %143 = arith.mulf %127, %135 : vector<8x32xf32>
    %144 = arith.addf %142, %143 : vector<8x32xf32>
    %145 = math.tanh %144 : vector<8x32xf32>
    %146 = arith.mulf %141, %145 : vector<8x32xf32>
    %147 = vector.extract_strided_slice %10 {offsets = [24, 0], sizes = [8, 1], strides = [1, 1]} : vector<72x1xi1> to vector<8x1xi1>
    %148 = vector.shape_cast %147 : vector<8x1xi1> to vector<8x1xi1>
    %149 = vector.broadcast %148 : vector<8x1xi1> to vector<8x32xi1>
    %150 = arith.select %149, %146, %115 : vector<8x32xi1>, vector<8x32xf32>
    %151 = vector.shape_cast %147 : vector<8x1xi1> to vector<8x1xi1>
    %152 = vector.broadcast %151 : vector<8x1xi1> to vector<8x32xi1>
    %153 = arith.select %152, %144, %118 : vector<8x32xi1>, vector<8x32xf32>
    %154 = vector.extract_strided_slice %6 {offsets = [32, 0], sizes = [8, 128], strides = [1, 1]} : vector<72x128xf32> to vector<8x128xf32>
    %cst_30 = arith.constant dense<0.000000e+00> : vector<8x128xf32>
    %155 = tpu.matmul %150, %11, %cst_30 {dimension_numbers = #tpu.dot_dimension_numbers<[1], [0], [0], [1], [0, 0, 1, 1], [], []>} : vector<8x32xf32>, vector<32x128xf32>, vector<8x128xf32> -> vector<8x128xf32>
    %156 = arith.addf %154, %155 : vector<8x128xf32>
    %157 = vector.extract_strided_slice %156 {offsets = [0, 0], sizes = [8, 32], strides = [1, 1]} : vector<8x128xf32> to vector<8x32xf32>
    %158 = arith.negf %157 : vector<8x32xf32>
    %159 = math.exp %158 : vector<8x32xf32>
    %cst_31 = arith.constant 1.000000e+00 : f32
    %160 = vector.broadcast %cst_31 : f32 to vector<8x32xf32>
    %161 = arith.addf %160, %159 : vector<8x32xf32>
    %162 = arith.divf %160, %161 : vector<8x32xf32>
    %163 = vector.extract_strided_slice %156 {offsets = [0, 32], sizes = [8, 32], strides = [1, 1]} : vector<8x128xf32> to vector<8x32xf32>
    %164 = arith.negf %163 : vector<8x32xf32>
    %165 = math.exp %164 : vector<8x32xf32>
    %cst_32 = arith.constant 1.000000e+00 : f32
    %166 = vector.broadcast %cst_32 : f32 to vector<8x32xf32>
    %167 = arith.addf %166, %165 : vector<8x32xf32>
    %168 = arith.divf %166, %167 : vector<8x32xf32>
    %169 = vector.extract_strided_slice %156 {offsets = [0, 64], sizes = [8, 32], strides = [1, 1]} : vector<8x128xf32> to vector<8x32xf32>
    %170 = math.tanh %169 : vector<8x32xf32>
    %171 = vector.extract_strided_slice %156 {offsets = [0, 96], sizes = [8, 32], strides = [1, 1]} : vector<8x128xf32> to vector<8x32xf32>
    %172 = arith.negf %171 : vector<8x32xf32>
    %173 = math.exp %172 : vector<8x32xf32>
    %cst_33 = arith.constant 1.000000e+00 : f32
    %174 = vector.broadcast %cst_33 : f32 to vector<8x32xf32>
    %175 = arith.addf %174, %173 : vector<8x32xf32>
    %176 = arith.divf %174, %175 : vector<8x32xf32>
    %177 = arith.mulf %168, %153 : vector<8x32xf32>
    %178 = arith.mulf %162, %170 : vector<8x32xf32>
    %179 = arith.addf %177, %178 : vector<8x32xf32>
    %180 = math.tanh %179 : vector<8x32xf32>
    %181 = arith.mulf %176, %180 : vector<8x32xf32>
    %182 = vector.extract_strided_slice %10 {offsets = [32, 0], sizes = [8, 1], strides = [1, 1]} : vector<72x1xi1> to vector<8x1xi1>
    %183 = vector.shape_cast %182 : vector<8x1xi1> to vector<8x1xi1>
    %184 = vector.broadcast %183 : vector<8x1xi1> to vector<8x32xi1>
    %185 = arith.select %184, %181, %150 : vector<8x32xi1>, vector<8x32xf32>
    %186 = vector.shape_cast %182 : vector<8x1xi1> to vector<8x1xi1>
    %187 = vector.broadcast %186 : vector<8x1xi1> to vector<8x32xi1>
    %188 = arith.select %187, %179, %153 : vector<8x32xi1>, vector<8x32xf32>
    %189 = vector.extract_strided_slice %6 {offsets = [40, 0], sizes = [8, 128], strides = [1, 1]} : vector<72x128xf32> to vector<8x128xf32>
    %cst_34 = arith.constant dense<0.000000e+00> : vector<8x128xf32>
    %190 = tpu.matmul %185, %11, %cst_34 {dimension_numbers = #tpu.dot_dimension_numbers<[1], [0], [0], [1], [0, 0, 1, 1], [], []>} : vector<8x32xf32>, vector<32x128xf32>, vector<8x128xf32> -> vector<8x128xf32>
    %191 = arith.addf %189, %190 : vector<8x128xf32>
    %192 = vector.extract_strided_slice %191 {offsets = [0, 0], sizes = [8, 32], strides = [1, 1]} : vector<8x128xf32> to vector<8x32xf32>
    %193 = arith.negf %192 : vector<8x32xf32>
    %194 = math.exp %193 : vector<8x32xf32>
    %cst_35 = arith.constant 1.000000e+00 : f32
    %195 = vector.broadcast %cst_35 : f32 to vector<8x32xf32>
    %196 = arith.addf %195, %194 : vector<8x32xf32>
    %197 = arith.divf %195, %196 : vector<8x32xf32>
    %198 = vector.extract_strided_slice %191 {offsets = [0, 32], sizes = [8, 32], strides = [1, 1]} : vector<8x128xf32> to vector<8x32xf32>
    %199 = arith.negf %198 : vector<8x32xf32>
    %200 = math.exp %199 : vector<8x32xf32>
    %cst_36 = arith.constant 1.000000e+00 : f32
    %201 = vector.broadcast %cst_36 : f32 to vector<8x32xf32>
    %202 = arith.addf %201, %200 : vector<8x32xf32>
    %203 = arith.divf %201, %202 : vector<8x32xf32>
    %204 = vector.extract_strided_slice %191 {offsets = [0, 64], sizes = [8, 32], strides = [1, 1]} : vector<8x128xf32> to vector<8x32xf32>
    %205 = math.tanh %204 : vector<8x32xf32>
    %206 = vector.extract_strided_slice %191 {offsets = [0, 96], sizes = [8, 32], strides = [1, 1]} : vector<8x128xf32> to vector<8x32xf32>
    %207 = arith.negf %206 : vector<8x32xf32>
    %208 = math.exp %207 : vector<8x32xf32>
    %cst_37 = arith.constant 1.000000e+00 : f32
    %209 = vector.broadcast %cst_37 : f32 to vector<8x32xf32>
    %210 = arith.addf %209, %208 : vector<8x32xf32>
    %211 = arith.divf %209, %210 : vector<8x32xf32>
    %212 = arith.mulf %203, %188 : vector<8x32xf32>
    %213 = arith.mulf %197, %205 : vector<8x32xf32>
    %214 = arith.addf %212, %213 : vector<8x32xf32>
    %215 = math.tanh %214 : vector<8x32xf32>
    %216 = arith.mulf %211, %215 : vector<8x32xf32>
    %217 = vector.extract_strided_slice %10 {offsets = [40, 0], sizes = [8, 1], strides = [1, 1]} : vector<72x1xi1> to vector<8x1xi1>
    %218 = vector.shape_cast %217 : vector<8x1xi1> to vector<8x1xi1>
    %219 = vector.broadcast %218 : vector<8x1xi1> to vector<8x32xi1>
    %220 = arith.select %219, %216, %185 : vector<8x32xi1>, vector<8x32xf32>
    %221 = vector.shape_cast %217 : vector<8x1xi1> to vector<8x1xi1>
    %222 = vector.broadcast %221 : vector<8x1xi1> to vector<8x32xi1>
    %223 = arith.select %222, %214, %188 : vector<8x32xi1>, vector<8x32xf32>
    %224 = vector.extract_strided_slice %6 {offsets = [48, 0], sizes = [8, 128], strides = [1, 1]} : vector<72x128xf32> to vector<8x128xf32>
    %cst_38 = arith.constant dense<0.000000e+00> : vector<8x128xf32>
    %225 = tpu.matmul %220, %11, %cst_38 {dimension_numbers = #tpu.dot_dimension_numbers<[1], [0], [0], [1], [0, 0, 1, 1], [], []>} : vector<8x32xf32>, vector<32x128xf32>, vector<8x128xf32> -> vector<8x128xf32>
    %226 = arith.addf %224, %225 : vector<8x128xf32>
    %227 = vector.extract_strided_slice %226 {offsets = [0, 0], sizes = [8, 32], strides = [1, 1]} : vector<8x128xf32> to vector<8x32xf32>
    %228 = arith.negf %227 : vector<8x32xf32>
    %229 = math.exp %228 : vector<8x32xf32>
    %cst_39 = arith.constant 1.000000e+00 : f32
    %230 = vector.broadcast %cst_39 : f32 to vector<8x32xf32>
    %231 = arith.addf %230, %229 : vector<8x32xf32>
    %232 = arith.divf %230, %231 : vector<8x32xf32>
    %233 = vector.extract_strided_slice %226 {offsets = [0, 32], sizes = [8, 32], strides = [1, 1]} : vector<8x128xf32> to vector<8x32xf32>
    %234 = arith.negf %233 : vector<8x32xf32>
    %235 = math.exp %234 : vector<8x32xf32>
    %cst_40 = arith.constant 1.000000e+00 : f32
    %236 = vector.broadcast %cst_40 : f32 to vector<8x32xf32>
    %237 = arith.addf %236, %235 : vector<8x32xf32>
    %238 = arith.divf %236, %237 : vector<8x32xf32>
    %239 = vector.extract_strided_slice %226 {offsets = [0, 64], sizes = [8, 32], strides = [1, 1]} : vector<8x128xf32> to vector<8x32xf32>
    %240 = math.tanh %239 : vector<8x32xf32>
    %241 = vector.extract_strided_slice %226 {offsets = [0, 96], sizes = [8, 32], strides = [1, 1]} : vector<8x128xf32> to vector<8x32xf32>
    %242 = arith.negf %241 : vector<8x32xf32>
    %243 = math.exp %242 : vector<8x32xf32>
    %cst_41 = arith.constant 1.000000e+00 : f32
    %244 = vector.broadcast %cst_41 : f32 to vector<8x32xf32>
    %245 = arith.addf %244, %243 : vector<8x32xf32>
    %246 = arith.divf %244, %245 : vector<8x32xf32>
    %247 = arith.mulf %238, %223 : vector<8x32xf32>
    %248 = arith.mulf %232, %240 : vector<8x32xf32>
    %249 = arith.addf %247, %248 : vector<8x32xf32>
    %250 = math.tanh %249 : vector<8x32xf32>
    %251 = arith.mulf %246, %250 : vector<8x32xf32>
    %252 = vector.extract_strided_slice %10 {offsets = [48, 0], sizes = [8, 1], strides = [1, 1]} : vector<72x1xi1> to vector<8x1xi1>
    %253 = vector.shape_cast %252 : vector<8x1xi1> to vector<8x1xi1>
    %254 = vector.broadcast %253 : vector<8x1xi1> to vector<8x32xi1>
    %255 = arith.select %254, %251, %220 : vector<8x32xi1>, vector<8x32xf32>
    %256 = vector.shape_cast %252 : vector<8x1xi1> to vector<8x1xi1>
    %257 = vector.broadcast %256 : vector<8x1xi1> to vector<8x32xi1>
    %258 = arith.select %257, %249, %223 : vector<8x32xi1>, vector<8x32xf32>
    %259 = vector.extract_strided_slice %6 {offsets = [56, 0], sizes = [8, 128], strides = [1, 1]} : vector<72x128xf32> to vector<8x128xf32>
    %cst_42 = arith.constant dense<0.000000e+00> : vector<8x128xf32>
    %260 = tpu.matmul %255, %11, %cst_42 {dimension_numbers = #tpu.dot_dimension_numbers<[1], [0], [0], [1], [0, 0, 1, 1], [], []>} : vector<8x32xf32>, vector<32x128xf32>, vector<8x128xf32> -> vector<8x128xf32>
    %261 = arith.addf %259, %260 : vector<8x128xf32>
    %262 = vector.extract_strided_slice %261 {offsets = [0, 0], sizes = [8, 32], strides = [1, 1]} : vector<8x128xf32> to vector<8x32xf32>
    %263 = arith.negf %262 : vector<8x32xf32>
    %264 = math.exp %263 : vector<8x32xf32>
    %cst_43 = arith.constant 1.000000e+00 : f32
    %265 = vector.broadcast %cst_43 : f32 to vector<8x32xf32>
    %266 = arith.addf %265, %264 : vector<8x32xf32>
    %267 = arith.divf %265, %266 : vector<8x32xf32>
    %268 = vector.extract_strided_slice %261 {offsets = [0, 32], sizes = [8, 32], strides = [1, 1]} : vector<8x128xf32> to vector<8x32xf32>
    %269 = arith.negf %268 : vector<8x32xf32>
    %270 = math.exp %269 : vector<8x32xf32>
    %cst_44 = arith.constant 1.000000e+00 : f32
    %271 = vector.broadcast %cst_44 : f32 to vector<8x32xf32>
    %272 = arith.addf %271, %270 : vector<8x32xf32>
    %273 = arith.divf %271, %272 : vector<8x32xf32>
    %274 = vector.extract_strided_slice %261 {offsets = [0, 64], sizes = [8, 32], strides = [1, 1]} : vector<8x128xf32> to vector<8x32xf32>
    %275 = math.tanh %274 : vector<8x32xf32>
    %276 = vector.extract_strided_slice %261 {offsets = [0, 96], sizes = [8, 32], strides = [1, 1]} : vector<8x128xf32> to vector<8x32xf32>
    %277 = arith.negf %276 : vector<8x32xf32>
    %278 = math.exp %277 : vector<8x32xf32>
    %cst_45 = arith.constant 1.000000e+00 : f32
    %279 = vector.broadcast %cst_45 : f32 to vector<8x32xf32>
    %280 = arith.addf %279, %278 : vector<8x32xf32>
    %281 = arith.divf %279, %280 : vector<8x32xf32>
    %282 = arith.mulf %273, %258 : vector<8x32xf32>
    %283 = arith.mulf %267, %275 : vector<8x32xf32>
    %284 = arith.addf %282, %283 : vector<8x32xf32>
    %285 = math.tanh %284 : vector<8x32xf32>
    %286 = arith.mulf %281, %285 : vector<8x32xf32>
    %287 = vector.extract_strided_slice %10 {offsets = [56, 0], sizes = [8, 1], strides = [1, 1]} : vector<72x1xi1> to vector<8x1xi1>
    %288 = vector.shape_cast %287 : vector<8x1xi1> to vector<8x1xi1>
    %289 = vector.broadcast %288 : vector<8x1xi1> to vector<8x32xi1>
    %290 = arith.select %289, %286, %255 : vector<8x32xi1>, vector<8x32xf32>
    %291 = vector.shape_cast %287 : vector<8x1xi1> to vector<8x1xi1>
    %292 = vector.broadcast %291 : vector<8x1xi1> to vector<8x32xi1>
    %293 = arith.select %292, %284, %258 : vector<8x32xi1>, vector<8x32xf32>
    %294 = vector.extract_strided_slice %6 {offsets = [64, 0], sizes = [8, 128], strides = [1, 1]} : vector<72x128xf32> to vector<8x128xf32>
    %cst_46 = arith.constant dense<0.000000e+00> : vector<8x128xf32>
    %295 = tpu.matmul %290, %11, %cst_46 {dimension_numbers = #tpu.dot_dimension_numbers<[1], [0], [0], [1], [0, 0, 1, 1], [], []>} : vector<8x32xf32>, vector<32x128xf32>, vector<8x128xf32> -> vector<8x128xf32>
    %296 = arith.addf %294, %295 : vector<8x128xf32>
    %297 = vector.extract_strided_slice %296 {offsets = [0, 0], sizes = [8, 32], strides = [1, 1]} : vector<8x128xf32> to vector<8x32xf32>
    %298 = arith.negf %297 : vector<8x32xf32>
    %299 = math.exp %298 : vector<8x32xf32>
    %cst_47 = arith.constant 1.000000e+00 : f32
    %300 = vector.broadcast %cst_47 : f32 to vector<8x32xf32>
    %301 = arith.addf %300, %299 : vector<8x32xf32>
    %302 = arith.divf %300, %301 : vector<8x32xf32>
    %303 = vector.extract_strided_slice %296 {offsets = [0, 32], sizes = [8, 32], strides = [1, 1]} : vector<8x128xf32> to vector<8x32xf32>
    %304 = arith.negf %303 : vector<8x32xf32>
    %305 = math.exp %304 : vector<8x32xf32>
    %cst_48 = arith.constant 1.000000e+00 : f32
    %306 = vector.broadcast %cst_48 : f32 to vector<8x32xf32>
    %307 = arith.addf %306, %305 : vector<8x32xf32>
    %308 = arith.divf %306, %307 : vector<8x32xf32>
    %309 = vector.extract_strided_slice %296 {offsets = [0, 64], sizes = [8, 32], strides = [1, 1]} : vector<8x128xf32> to vector<8x32xf32>
    %310 = math.tanh %309 : vector<8x32xf32>
    %311 = vector.extract_strided_slice %296 {offsets = [0, 96], sizes = [8, 32], strides = [1, 1]} : vector<8x128xf32> to vector<8x32xf32>
    %312 = arith.negf %311 : vector<8x32xf32>
    %313 = math.exp %312 : vector<8x32xf32>
    %cst_49 = arith.constant 1.000000e+00 : f32
    %314 = vector.broadcast %cst_49 : f32 to vector<8x32xf32>
    %315 = arith.addf %314, %313 : vector<8x32xf32>
    %316 = arith.divf %314, %315 : vector<8x32xf32>
    %317 = arith.mulf %308, %293 : vector<8x32xf32>
    %318 = arith.mulf %302, %310 : vector<8x32xf32>
    %319 = arith.addf %317, %318 : vector<8x32xf32>
    %320 = math.tanh %319 : vector<8x32xf32>
    %321 = arith.mulf %316, %320 : vector<8x32xf32>
    %322 = vector.extract_strided_slice %10 {offsets = [64, 0], sizes = [8, 1], strides = [1, 1]} : vector<72x1xi1> to vector<8x1xi1>
    %323 = vector.shape_cast %322 : vector<8x1xi1> to vector<8x1xi1>
    %324 = vector.broadcast %323 : vector<8x1xi1> to vector<8x32xi1>
    %325 = arith.select %324, %321, %290 : vector<8x32xi1>, vector<8x32xf32>
    %c0_50 = arith.constant 0 : index
    %c0_51 = arith.constant 0 : index
    %c0_52 = arith.constant 0 : index
    %326 = vector.load %arg3[%c0_50, %c0_51, %c0_52] : memref<1x8x16xf32, #tpu.memory_space<vmem>>, vector<1x8x16xf32>
    %327 = vector.shape_cast %326 : vector<1x8x16xf32> to vector<8x16xf32>
    %c0_53 = arith.constant 0 : index
    %c0_54 = arith.constant 0 : index
    %328 = vector.load %arg7[%c0_53, %c0_54] : memref<16x128xf32, #tpu.memory_space<vmem>>, vector<16x128xf32>
    %cst_55 = arith.constant dense<0.000000e+00> : vector<8x128xf32>
    %329 = tpu.matmul %327, %328, %cst_55 {dimension_numbers = #tpu.dot_dimension_numbers<[1], [0], [0], [1], [0, 0, 1, 1], [], []>} : vector<8x16xf32>, vector<16x128xf32>, vector<8x128xf32> -> vector<8x128xf32>
    %c0_56 = arith.constant 0 : index
    %c0_57 = arith.constant 0 : index
    %330 = vector.load %arg8[%c0_56, %c0_57] : memref<32x128xf32, #tpu.memory_space<vmem>>, vector<32x128xf32>
    %cst_58 = arith.constant dense<0.000000e+00> : vector<8x128xf32>
    %331 = tpu.matmul %325, %330, %cst_58 {dimension_numbers = #tpu.dot_dimension_numbers<[1], [0], [0], [1], [0, 0, 1, 1], [], []>} : vector<8x32xf32>, vector<32x128xf32>, vector<8x128xf32> -> vector<8x128xf32>
    %332 = arith.addf %329, %331 : vector<8x128xf32>
    %c0_59 = arith.constant 0 : index
    %c0_60 = arith.constant 0 : index
    %333 = vector.load %arg10[%c0_59, %c0_60] : memref<1x128xf32, #tpu.memory_space<vmem>>, vector<1x128xf32>
    %334 = vector.broadcast %333 : vector<1x128xf32> to vector<8x128xf32>
    %335 = arith.addf %332, %334 : vector<8x128xf32>
    %c0_61 = arith.constant 0 : index
    %c0_62 = arith.constant 0 : index
    %336 = vector.load %arg9[%c0_61, %c0_62] : memref<32x128xf32, #tpu.memory_space<vmem>>, vector<32x128xf32>
    %cst_63 = arith.constant 0.000000e+00 : f32
    %337 = vector.broadcast %cst_63 : f32 to vector<1x32xf32>
    %cst_64 = arith.constant 0.000000e+00 : f32
    %338 = vector.broadcast %cst_64 : f32 to vector<1x32xf32>
    %339 = vector.extract_strided_slice %335 {offsets = [0, 0], sizes = [1, 128], strides = [1, 1]} : vector<8x128xf32> to vector<1x128xf32>
    %cst_65 = arith.constant dense<0.000000e+00> : vector<1x128xf32>
    %340 = tpu.matmul %337, %336, %cst_65 {dimension_numbers = #tpu.dot_dimension_numbers<[1], [0], [0], [1], [0, 0, 1, 1], [], []>} : vector<1x32xf32>, vector<32x128xf32>, vector<1x128xf32> -> vector<1x128xf32>
    %341 = arith.addf %339, %340 : vector<1x128xf32>
    %342 = vector.extract_strided_slice %341 {offsets = [0, 0], sizes = [1, 32], strides = [1, 1]} : vector<1x128xf32> to vector<1x32xf32>
    %343 = arith.negf %342 : vector<1x32xf32>
    %344 = math.exp %343 : vector<1x32xf32>
    %cst_66 = arith.constant 1.000000e+00 : f32
    %345 = vector.broadcast %cst_66 : f32 to vector<1x32xf32>
    %346 = arith.addf %345, %344 : vector<1x32xf32>
    %347 = arith.divf %345, %346 : vector<1x32xf32>
    %348 = vector.extract_strided_slice %341 {offsets = [0, 32], sizes = [1, 32], strides = [1, 1]} : vector<1x128xf32> to vector<1x32xf32>
    %349 = arith.negf %348 : vector<1x32xf32>
    %350 = math.exp %349 : vector<1x32xf32>
    %cst_67 = arith.constant 1.000000e+00 : f32
    %351 = vector.broadcast %cst_67 : f32 to vector<1x32xf32>
    %352 = arith.addf %351, %350 : vector<1x32xf32>
    %353 = arith.divf %351, %352 : vector<1x32xf32>
    %354 = vector.extract_strided_slice %341 {offsets = [0, 64], sizes = [1, 32], strides = [1, 1]} : vector<1x128xf32> to vector<1x32xf32>
    %355 = math.tanh %354 : vector<1x32xf32>
    %356 = vector.extract_strided_slice %341 {offsets = [0, 96], sizes = [1, 32], strides = [1, 1]} : vector<1x128xf32> to vector<1x32xf32>
    %357 = arith.negf %356 : vector<1x32xf32>
    %358 = math.exp %357 : vector<1x32xf32>
    %cst_68 = arith.constant 1.000000e+00 : f32
    %359 = vector.broadcast %cst_68 : f32 to vector<1x32xf32>
    %360 = arith.addf %359, %358 : vector<1x32xf32>
    %361 = arith.divf %359, %360 : vector<1x32xf32>
    %362 = arith.mulf %353, %338 : vector<1x32xf32>
    %363 = arith.mulf %347, %355 : vector<1x32xf32>
    %364 = arith.addf %362, %363 : vector<1x32xf32>
    %365 = math.tanh %364 : vector<1x32xf32>
    %366 = arith.mulf %361, %365 : vector<1x32xf32>
    %c0_69 = arith.constant 0 : index
    %c0_70 = arith.constant 0 : index
    %367 = vector.load %arg14[%c0_69, %c0_70] : memref<8x32xf32, #tpu.memory_space<vmem>>, vector<1x32xf32>
    tpu.vector_store %arg14[%c0_69, %c0_70], %366 {strides = array<i32>} : memref<8x32xf32, #tpu.memory_space<vmem>>, vector<1x32xf32>,
    %368 = vector.extract_strided_slice %335 {offsets = [1, 0], sizes = [1, 128], strides = [1, 1]} : vector<8x128xf32> to vector<1x128xf32>
    %cst_71 = arith.constant dense<0.000000e+00> : vector<1x128xf32>
    %369 = tpu.matmul %366, %336, %cst_71 {dimension_numbers = #tpu.dot_dimension_numbers<[1], [0], [0], [1], [0, 0, 1, 1], [], []>} : vector<1x32xf32>, vector<32x128xf32>, vector<1x128xf32> -> vector<1x128xf32>
    %370 = arith.addf %368, %369 : vector<1x128xf32>
    %371 = vector.extract_strided_slice %370 {offsets = [0, 0], sizes = [1, 32], strides = [1, 1]} : vector<1x128xf32> to vector<1x32xf32>
    %372 = arith.negf %371 : vector<1x32xf32>
    %373 = math.exp %372 : vector<1x32xf32>
    %cst_72 = arith.constant 1.000000e+00 : f32
    %374 = vector.broadcast %cst_72 : f32 to vector<1x32xf32>
    %375 = arith.addf %374, %373 : vector<1x32xf32>
    %376 = arith.divf %374, %375 : vector<1x32xf32>
    %377 = vector.extract_strided_slice %370 {offsets = [0, 32], sizes = [1, 32], strides = [1, 1]} : vector<1x128xf32> to vector<1x32xf32>
    %378 = arith.negf %377 : vector<1x32xf32>
    %379 = math.exp %378 : vector<1x32xf32>
    %cst_73 = arith.constant 1.000000e+00 : f32
    %380 = vector.broadcast %cst_73 : f32 to vector<1x32xf32>
    %381 = arith.addf %380, %379 : vector<1x32xf32>
    %382 = arith.divf %380, %381 : vector<1x32xf32>
    %383 = vector.extract_strided_slice %370 {offsets = [0, 64], sizes = [1, 32], strides = [1, 1]} : vector<1x128xf32> to vector<1x32xf32>
    %384 = math.tanh %383 : vector<1x32xf32>
    %385 = vector.extract_strided_slice %370 {offsets = [0, 96], sizes = [1, 32], strides = [1, 1]} : vector<1x128xf32> to vector<1x32xf32>
    %386 = arith.negf %385 : vector<1x32xf32>
    %387 = math.exp %386 : vector<1x32xf32>
    %cst_74 = arith.constant 1.000000e+00 : f32
    %388 = vector.broadcast %cst_74 : f32 to vector<1x32xf32>
    %389 = arith.addf %388, %387 : vector<1x32xf32>
    %390 = arith.divf %388, %389 : vector<1x32xf32>
    %391 = arith.mulf %382, %364 : vector<1x32xf32>
    %392 = arith.mulf %376, %384 : vector<1x32xf32>
    %393 = arith.addf %391, %392 : vector<1x32xf32>
    %394 = math.tanh %393 : vector<1x32xf32>
    %395 = arith.mulf %390, %394 : vector<1x32xf32>
    %c1 = arith.constant 1 : index
    %c0_75 = arith.constant 0 : index
    %396 = vector.load %arg14[%c1, %c0_75] : memref<8x32xf32, #tpu.memory_space<vmem>>, vector<1x32xf32>
    tpu.vector_store %arg14[%c1, %c0_75], %395 {strides = array<i32>} : memref<8x32xf32, #tpu.memory_space<vmem>>, vector<1x32xf32>,
    %397 = vector.extract_strided_slice %335 {offsets = [2, 0], sizes = [1, 128], strides = [1, 1]} : vector<8x128xf32> to vector<1x128xf32>
    %cst_76 = arith.constant dense<0.000000e+00> : vector<1x128xf32>
    %398 = tpu.matmul %395, %336, %cst_76 {dimension_numbers = #tpu.dot_dimension_numbers<[1], [0], [0], [1], [0, 0, 1, 1], [], []>} : vector<1x32xf32>, vector<32x128xf32>, vector<1x128xf32> -> vector<1x128xf32>
    %399 = arith.addf %397, %398 : vector<1x128xf32>
    %400 = vector.extract_strided_slice %399 {offsets = [0, 0], sizes = [1, 32], strides = [1, 1]} : vector<1x128xf32> to vector<1x32xf32>
    %401 = arith.negf %400 : vector<1x32xf32>
    %402 = math.exp %401 : vector<1x32xf32>
    %cst_77 = arith.constant 1.000000e+00 : f32
    %403 = vector.broadcast %cst_77 : f32 to vector<1x32xf32>
    %404 = arith.addf %403, %402 : vector<1x32xf32>
    %405 = arith.divf %403, %404 : vector<1x32xf32>
    %406 = vector.extract_strided_slice %399 {offsets = [0, 32], sizes = [1, 32], strides = [1, 1]} : vector<1x128xf32> to vector<1x32xf32>
    %407 = arith.negf %406 : vector<1x32xf32>
    %408 = math.exp %407 : vector<1x32xf32>
    %cst_78 = arith.constant 1.000000e+00 : f32
    %409 = vector.broadcast %cst_78 : f32 to vector<1x32xf32>
    %410 = arith.addf %409, %408 : vector<1x32xf32>
    %411 = arith.divf %409, %410 : vector<1x32xf32>
    %412 = vector.extract_strided_slice %399 {offsets = [0, 64], sizes = [1, 32], strides = [1, 1]} : vector<1x128xf32> to vector<1x32xf32>
    %413 = math.tanh %412 : vector<1x32xf32>
    %414 = vector.extract_strided_slice %399 {offsets = [0, 96], sizes = [1, 32], strides = [1, 1]} : vector<1x128xf32> to vector<1x32xf32>
    %415 = arith.negf %414 : vector<1x32xf32>
    %416 = math.exp %415 : vector<1x32xf32>
    %cst_79 = arith.constant 1.000000e+00 : f32
    %417 = vector.broadcast %cst_79 : f32 to vector<1x32xf32>
    %418 = arith.addf %417, %416 : vector<1x32xf32>
    %419 = arith.divf %417, %418 : vector<1x32xf32>
    %420 = arith.mulf %411, %393 : vector<1x32xf32>
    %421 = arith.mulf %405, %413 : vector<1x32xf32>
    %422 = arith.addf %420, %421 : vector<1x32xf32>
    %423 = math.tanh %422 : vector<1x32xf32>
    %424 = arith.mulf %419, %423 : vector<1x32xf32>
    %c2 = arith.constant 2 : index
    %c0_80 = arith.constant 0 : index
    %425 = vector.load %arg14[%c2, %c0_80] : memref<8x32xf32, #tpu.memory_space<vmem>>, vector<1x32xf32>
    tpu.vector_store %arg14[%c2, %c0_80], %424 {strides = array<i32>} : memref<8x32xf32, #tpu.memory_space<vmem>>, vector<1x32xf32>,
    %426 = vector.extract_strided_slice %335 {offsets = [3, 0], sizes = [1, 128], strides = [1, 1]} : vector<8x128xf32> to vector<1x128xf32>
    %cst_81 = arith.constant dense<0.000000e+00> : vector<1x128xf32>
    %427 = tpu.matmul %424, %336, %cst_81 {dimension_numbers = #tpu.dot_dimension_numbers<[1], [0], [0], [1], [0, 0, 1, 1], [], []>} : vector<1x32xf32>, vector<32x128xf32>, vector<1x128xf32> -> vector<1x128xf32>
    %428 = arith.addf %426, %427 : vector<1x128xf32>
    %429 = vector.extract_strided_slice %428 {offsets = [0, 0], sizes = [1, 32], strides = [1, 1]} : vector<1x128xf32> to vector<1x32xf32>
    %430 = arith.negf %429 : vector<1x32xf32>
    %431 = math.exp %430 : vector<1x32xf32>
    %cst_82 = arith.constant 1.000000e+00 : f32
    %432 = vector.broadcast %cst_82 : f32 to vector<1x32xf32>
    %433 = arith.addf %432, %431 : vector<1x32xf32>
    %434 = arith.divf %432, %433 : vector<1x32xf32>
    %435 = vector.extract_strided_slice %428 {offsets = [0, 32], sizes = [1, 32], strides = [1, 1]} : vector<1x128xf32> to vector<1x32xf32>
    %436 = arith.negf %435 : vector<1x32xf32>
    %437 = math.exp %436 : vector<1x32xf32>
    %cst_83 = arith.constant 1.000000e+00 : f32
    %438 = vector.broadcast %cst_83 : f32 to vector<1x32xf32>
    %439 = arith.addf %438, %437 : vector<1x32xf32>
    %440 = arith.divf %438, %439 : vector<1x32xf32>
    %441 = vector.extract_strided_slice %428 {offsets = [0, 64], sizes = [1, 32], strides = [1, 1]} : vector<1x128xf32> to vector<1x32xf32>
    %442 = math.tanh %441 : vector<1x32xf32>
    %443 = vector.extract_strided_slice %428 {offsets = [0, 96], sizes = [1, 32], strides = [1, 1]} : vector<1x128xf32> to vector<1x32xf32>
    %444 = arith.negf %443 : vector<1x32xf32>
    %445 = math.exp %444 : vector<1x32xf32>
    %cst_84 = arith.constant 1.000000e+00 : f32
    %446 = vector.broadcast %cst_84 : f32 to vector<1x32xf32>
    %447 = arith.addf %446, %445 : vector<1x32xf32>
    %448 = arith.divf %446, %447 : vector<1x32xf32>
    %449 = arith.mulf %440, %422 : vector<1x32xf32>
    %450 = arith.mulf %434, %442 : vector<1x32xf32>
    %451 = arith.addf %449, %450 : vector<1x32xf32>
    %452 = math.tanh %451 : vector<1x32xf32>
    %453 = arith.mulf %448, %452 : vector<1x32xf32>
    %c3 = arith.constant 3 : index
    %c0_85 = arith.constant 0 : index
    %454 = vector.load %arg14[%c3, %c0_85] : memref<8x32xf32, #tpu.memory_space<vmem>>, vector<1x32xf32>
    tpu.vector_store %arg14[%c3, %c0_85], %453 {strides = array<i32>} : memref<8x32xf32, #tpu.memory_space<vmem>>, vector<1x32xf32>,
    %455 = vector.extract_strided_slice %335 {offsets = [4, 0], sizes = [1, 128], strides = [1, 1]} : vector<8x128xf32> to vector<1x128xf32>
    %cst_86 = arith.constant dense<0.000000e+00> : vector<1x128xf32>
    %456 = tpu.matmul %453, %336, %cst_86 {dimension_numbers = #tpu.dot_dimension_numbers<[1], [0], [0], [1], [0, 0, 1, 1], [], []>} : vector<1x32xf32>, vector<32x128xf32>, vector<1x128xf32> -> vector<1x128xf32>
    %457 = arith.addf %455, %456 : vector<1x128xf32>
    %458 = vector.extract_strided_slice %457 {offsets = [0, 0], sizes = [1, 32], strides = [1, 1]} : vector<1x128xf32> to vector<1x32xf32>
    %459 = arith.negf %458 : vector<1x32xf32>
    %460 = math.exp %459 : vector<1x32xf32>
    %cst_87 = arith.constant 1.000000e+00 : f32
    %461 = vector.broadcast %cst_87 : f32 to vector<1x32xf32>
    %462 = arith.addf %461, %460 : vector<1x32xf32>
    %463 = arith.divf %461, %462 : vector<1x32xf32>
    %464 = vector.extract_strided_slice %457 {offsets = [0, 32], sizes = [1, 32], strides = [1, 1]} : vector<1x128xf32> to vector<1x32xf32>
    %465 = arith.negf %464 : vector<1x32xf32>
    %466 = math.exp %465 : vector<1x32xf32>
    %cst_88 = arith.constant 1.000000e+00 : f32
    %467 = vector.broadcast %cst_88 : f32 to vector<1x32xf32>
    %468 = arith.addf %467, %466 : vector<1x32xf32>
    %469 = arith.divf %467, %468 : vector<1x32xf32>
    %470 = vector.extract_strided_slice %457 {offsets = [0, 64], sizes = [1, 32], strides = [1, 1]} : vector<1x128xf32> to vector<1x32xf32>
    %471 = math.tanh %470 : vector<1x32xf32>
    %472 = vector.extract_strided_slice %457 {offsets = [0, 96], sizes = [1, 32], strides = [1, 1]} : vector<1x128xf32> to vector<1x32xf32>
    %473 = arith.negf %472 : vector<1x32xf32>
    %474 = math.exp %473 : vector<1x32xf32>
    %cst_89 = arith.constant 1.000000e+00 : f32
    %475 = vector.broadcast %cst_89 : f32 to vector<1x32xf32>
    %476 = arith.addf %475, %474 : vector<1x32xf32>
    %477 = arith.divf %475, %476 : vector<1x32xf32>
    %478 = arith.mulf %469, %451 : vector<1x32xf32>
    %479 = arith.mulf %463, %471 : vector<1x32xf32>
    %480 = arith.addf %478, %479 : vector<1x32xf32>
    %481 = math.tanh %480 : vector<1x32xf32>
    %482 = arith.mulf %477, %481 : vector<1x32xf32>
    %c4 = arith.constant 4 : index
    %c0_90 = arith.constant 0 : index
    %483 = vector.load %arg14[%c4, %c0_90] : memref<8x32xf32, #tpu.memory_space<vmem>>, vector<1x32xf32>
    tpu.vector_store %arg14[%c4, %c0_90], %482 {strides = array<i32>} : memref<8x32xf32, #tpu.memory_space<vmem>>, vector<1x32xf32>,
    %484 = vector.extract_strided_slice %335 {offsets = [5, 0], sizes = [1, 128], strides = [1, 1]} : vector<8x128xf32> to vector<1x128xf32>
    %cst_91 = arith.constant dense<0.000000e+00> : vector<1x128xf32>
    %485 = tpu.matmul %482, %336, %cst_91 {dimension_numbers = #tpu.dot_dimension_numbers<[1], [0], [0], [1], [0, 0, 1, 1], [], []>} : vector<1x32xf32>, vector<32x128xf32>, vector<1x128xf32> -> vector<1x128xf32>
    %486 = arith.addf %484, %485 : vector<1x128xf32>
    %487 = vector.extract_strided_slice %486 {offsets = [0, 0], sizes = [1, 32], strides = [1, 1]} : vector<1x128xf32> to vector<1x32xf32>
    %488 = arith.negf %487 : vector<1x32xf32>
    %489 = math.exp %488 : vector<1x32xf32>
    %cst_92 = arith.constant 1.000000e+00 : f32
    %490 = vector.broadcast %cst_92 : f32 to vector<1x32xf32>
    %491 = arith.addf %490, %489 : vector<1x32xf32>
    %492 = arith.divf %490, %491 : vector<1x32xf32>
    %493 = vector.extract_strided_slice %486 {offsets = [0, 32], sizes = [1, 32], strides = [1, 1]} : vector<1x128xf32> to vector<1x32xf32>
    %494 = arith.negf %493 : vector<1x32xf32>
    %495 = math.exp %494 : vector<1x32xf32>
    %cst_93 = arith.constant 1.000000e+00 : f32
    %496 = vector.broadcast %cst_93 : f32 to vector<1x32xf32>
    %497 = arith.addf %496, %495 : vector<1x32xf32>
    %498 = arith.divf %496, %497 : vector<1x32xf32>
    %499 = vector.extract_strided_slice %486 {offsets = [0, 64], sizes = [1, 32], strides = [1, 1]} : vector<1x128xf32> to vector<1x32xf32>
    %500 = math.tanh %499 : vector<1x32xf32>
    %501 = vector.extract_strided_slice %486 {offsets = [0, 96], sizes = [1, 32], strides = [1, 1]} : vector<1x128xf32> to vector<1x32xf32>
    %502 = arith.negf %501 : vector<1x32xf32>
    %503 = math.exp %502 : vector<1x32xf32>
    %cst_94 = arith.constant 1.000000e+00 : f32
    %504 = vector.broadcast %cst_94 : f32 to vector<1x32xf32>
    %505 = arith.addf %504, %503 : vector<1x32xf32>
    %506 = arith.divf %504, %505 : vector<1x32xf32>
    %507 = arith.mulf %498, %480 : vector<1x32xf32>
    %508 = arith.mulf %492, %500 : vector<1x32xf32>
    %509 = arith.addf %507, %508 : vector<1x32xf32>
    %510 = math.tanh %509 : vector<1x32xf32>
    %511 = arith.mulf %506, %510 : vector<1x32xf32>
    %c5 = arith.constant 5 : index
    %c0_95 = arith.constant 0 : index
    %512 = vector.load %arg14[%c5, %c0_95] : memref<8x32xf32, #tpu.memory_space<vmem>>, vector<1x32xf32>
    tpu.vector_store %arg14[%c5, %c0_95], %511 {strides = array<i32>} : memref<8x32xf32, #tpu.memory_space<vmem>>, vector<1x32xf32>,
    %513 = vector.extract_strided_slice %335 {offsets = [6, 0], sizes = [1, 128], strides = [1, 1]} : vector<8x128xf32> to vector<1x128xf32>
    %cst_96 = arith.constant dense<0.000000e+00> : vector<1x128xf32>
    %514 = tpu.matmul %511, %336, %cst_96 {dimension_numbers = #tpu.dot_dimension_numbers<[1], [0], [0], [1], [0, 0, 1, 1], [], []>} : vector<1x32xf32>, vector<32x128xf32>, vector<1x128xf32> -> vector<1x128xf32>
    %515 = arith.addf %513, %514 : vector<1x128xf32>
    %516 = vector.extract_strided_slice %515 {offsets = [0, 0], sizes = [1, 32], strides = [1, 1]} : vector<1x128xf32> to vector<1x32xf32>
    %517 = arith.negf %516 : vector<1x32xf32>
    %518 = math.exp %517 : vector<1x32xf32>
    %cst_97 = arith.constant 1.000000e+00 : f32
    %519 = vector.broadcast %cst_97 : f32 to vector<1x32xf32>
    %520 = arith.addf %519, %518 : vector<1x32xf32>
    %521 = arith.divf %519, %520 : vector<1x32xf32>
    %522 = vector.extract_strided_slice %515 {offsets = [0, 32], sizes = [1, 32], strides = [1, 1]} : vector<1x128xf32> to vector<1x32xf32>
    %523 = arith.negf %522 : vector<1x32xf32>
    %524 = math.exp %523 : vector<1x32xf32>
    %cst_98 = arith.constant 1.000000e+00 : f32
    %525 = vector.broadcast %cst_98 : f32 to vector<1x32xf32>
    %526 = arith.addf %525, %524 : vector<1x32xf32>
    %527 = arith.divf %525, %526 : vector<1x32xf32>
    %528 = vector.extract_strided_slice %515 {offsets = [0, 64], sizes = [1, 32], strides = [1, 1]} : vector<1x128xf32> to vector<1x32xf32>
    %529 = math.tanh %528 : vector<1x32xf32>
    %530 = vector.extract_strided_slice %515 {offsets = [0, 96], sizes = [1, 32], strides = [1, 1]} : vector<1x128xf32> to vector<1x32xf32>
    %531 = arith.negf %530 : vector<1x32xf32>
    %532 = math.exp %531 : vector<1x32xf32>
    %cst_99 = arith.constant 1.000000e+00 : f32
    %533 = vector.broadcast %cst_99 : f32 to vector<1x32xf32>
    %534 = arith.addf %533, %532 : vector<1x32xf32>
    %535 = arith.divf %533, %534 : vector<1x32xf32>
    %536 = arith.mulf %527, %509 : vector<1x32xf32>
    %537 = arith.mulf %521, %529 : vector<1x32xf32>
    %538 = arith.addf %536, %537 : vector<1x32xf32>
    %539 = math.tanh %538 : vector<1x32xf32>
    %540 = arith.mulf %535, %539 : vector<1x32xf32>
    %c6 = arith.constant 6 : index
    %c0_100 = arith.constant 0 : index
    %541 = vector.load %arg14[%c6, %c0_100] : memref<8x32xf32, #tpu.memory_space<vmem>>, vector<1x32xf32>
    tpu.vector_store %arg14[%c6, %c0_100], %540 {strides = array<i32>} : memref<8x32xf32, #tpu.memory_space<vmem>>, vector<1x32xf32>,
    %542 = vector.extract_strided_slice %335 {offsets = [7, 0], sizes = [1, 128], strides = [1, 1]} : vector<8x128xf32> to vector<1x128xf32>
    %cst_101 = arith.constant dense<0.000000e+00> : vector<1x128xf32>
    %543 = tpu.matmul %540, %336, %cst_101 {dimension_numbers = #tpu.dot_dimension_numbers<[1], [0], [0], [1], [0, 0, 1, 1], [], []>} : vector<1x32xf32>, vector<32x128xf32>, vector<1x128xf32> -> vector<1x128xf32>
    %544 = arith.addf %542, %543 : vector<1x128xf32>
    %545 = vector.extract_strided_slice %544 {offsets = [0, 0], sizes = [1, 32], strides = [1, 1]} : vector<1x128xf32> to vector<1x32xf32>
    %546 = arith.negf %545 : vector<1x32xf32>
    %547 = math.exp %546 : vector<1x32xf32>
    %cst_102 = arith.constant 1.000000e+00 : f32
    %548 = vector.broadcast %cst_102 : f32 to vector<1x32xf32>
    %549 = arith.addf %548, %547 : vector<1x32xf32>
    %550 = arith.divf %548, %549 : vector<1x32xf32>
    %551 = vector.extract_strided_slice %544 {offsets = [0, 32], sizes = [1, 32], strides = [1, 1]} : vector<1x128xf32> to vector<1x32xf32>
    %552 = arith.negf %551 : vector<1x32xf32>
    %553 = math.exp %552 : vector<1x32xf32>
    %cst_103 = arith.constant 1.000000e+00 : f32
    %554 = vector.broadcast %cst_103 : f32 to vector<1x32xf32>
    %555 = arith.addf %554, %553 : vector<1x32xf32>
    %556 = arith.divf %554, %555 : vector<1x32xf32>
    %557 = vector.extract_strided_slice %544 {offsets = [0, 64], sizes = [1, 32], strides = [1, 1]} : vector<1x128xf32> to vector<1x32xf32>
    %558 = math.tanh %557 : vector<1x32xf32>
    %559 = vector.extract_strided_slice %544 {offsets = [0, 96], sizes = [1, 32], strides = [1, 1]} : vector<1x128xf32> to vector<1x32xf32>
    %560 = arith.negf %559 : vector<1x32xf32>
    %561 = math.exp %560 : vector<1x32xf32>
    %cst_104 = arith.constant 1.000000e+00 : f32
    %562 = vector.broadcast %cst_104 : f32 to vector<1x32xf32>
    %563 = arith.addf %562, %561 : vector<1x32xf32>
    %564 = arith.divf %562, %563 : vector<1x32xf32>
    %565 = arith.mulf %556, %538 : vector<1x32xf32>
    %566 = arith.mulf %550, %558 : vector<1x32xf32>
    %567 = arith.addf %565, %566 : vector<1x32xf32>
    %568 = math.tanh %567 : vector<1x32xf32>
    %569 = arith.mulf %564, %568 : vector<1x32xf32>
    %c7 = arith.constant 7 : index
    %c0_105 = arith.constant 0 : index
    %570 = vector.load %arg14[%c7, %c0_105] : memref<8x32xf32, #tpu.memory_space<vmem>>, vector<1x32xf32>
    tpu.vector_store %arg14[%c7, %c0_105], %569 {strides = array<i32>} : memref<8x32xf32, #tpu.memory_space<vmem>>, vector<1x32xf32>,
    %c0_106 = arith.constant 0 : index
    %c0_107 = arith.constant 0 : index
    %571 = vector.load %arg14[%c0_106, %c0_107] : memref<8x32xf32, #tpu.memory_space<vmem>>, vector<8x32xf32>
    %c0_108 = arith.constant 0 : index
    %c0_109 = arith.constant 0 : index
    %572 = vector.load %arg11[%c0_108, %c0_109] : memref<32x128xf32, #tpu.memory_space<vmem>>, vector<32x128xf32>
    %cst_110 = arith.constant dense<0.000000e+00> : vector<8x128xf32>
    %573 = tpu.matmul %571, %572, %cst_110 {dimension_numbers = #tpu.dot_dimension_numbers<[1], [0], [0], [1], [0, 0, 1, 1], [], []>} : vector<8x32xf32>, vector<32x128xf32>, vector<8x128xf32> -> vector<8x128xf32>
    %c0_111 = arith.constant 0 : index
    %c0_112 = arith.constant 0 : index
    %574 = vector.load %arg12[%c0_111, %c0_112] : memref<1x128xf32, #tpu.memory_space<vmem>>, vector<1x128xf32>
    %575 = vector.broadcast %574 : vector<1x128xf32> to vector<8x128xf32>
    %576 = arith.addf %573, %575 : vector<8x128xf32>
    %cst_113 = arith.constant dense<0xFF800000> : vector<8xf32>
    %577 = vector.multi_reduction <maximumf>, %576, %cst_113 [1] : vector<8x128xf32> to vector<8xf32>
    %578 = vector.shape_cast %577 : vector<8xf32> to vector<8x1xf32>
    %579 = vector.broadcast %578 : vector<8x1xf32> to vector<8x128xf32>
    %580 = arith.subf %576, %579 : vector<8x128xf32>
    %581 = math.exp %580 : vector<8x128xf32>
    %cst_114 = arith.constant dense<0.000000e+00> : vector<8xf32>
    %582 = vector.multi_reduction <add>, %581, %cst_114 [1] : vector<8x128xf32> to vector<8xf32>
    %583 = vector.shape_cast %582 : vector<8xf32> to vector<8x1xf32>
    %584 = math.log %583 : vector<8x1xf32>
    %585 = vector.broadcast %584 : vector<8x1xf32> to vector<8x128xf32>
    %586 = arith.subf %580, %585 : vector<8x128xf32>
    %c0_115 = arith.constant 0 : index
    %c0_116 = arith.constant 0 : index
    %c0_117 = arith.constant 0 : index
    %587 = vector.load %arg13[%c0_115, %c0_116, %c0_117] : memref<1x8x128xf32, #tpu.memory_space<vmem>>, vector<1x8x128xf32>
    %588 = vector.shape_cast %587 : vector<1x8x128xf32> to vector<8x128xf32>
    %589 = vector.shape_cast %586 : vector<8x128xf32> to vector<1x8x128xf32>
    tpu.vector_store %arg13[%c0_115, %c0_116, %c0_117], %589 {strides = array<i32>} : memref<1x8x128xf32, #tpu.memory_space<vmem>>, vector<1x8x128xf32>,
    return
  }
  func.func @transform_0(%arg0: i32) -> (i32, i32, i32) {
    %c0_i32 = arith.constant 0 : i32
    %c0_i32_0 = arith.constant 0 : i32
    %c0_i32_1 = arith.constant 0 : i32
    return %arg0, %c0_i32, %c0_i32_0 : i32, i32, i32
  }
  func.func @transform_1(%arg0: i32) -> (i32, i32, i32) {
    %c0_i32 = arith.constant 0 : i32
    %c0_i32_0 = arith.constant 0 : i32
    %c0_i32_1 = arith.constant 0 : i32
    return %arg0, %c0_i32, %c0_i32_0 : i32, i32, i32
  }
  func.func @transform_2(%arg0: i32) -> (i32, i32, i32) {
    %c0_i32 = arith.constant 0 : i32
    %c0_i32_0 = arith.constant 0 : i32
    %c0_i32_1 = arith.constant 0 : i32
    return %arg0, %c0_i32, %c0_i32_0 : i32, i32, i32
  }
  func.func @transform_3(%arg0: i32) -> (i32, i32) {
    %c0_i32 = arith.constant 0 : i32
    %c0_i32_0 = arith.constant 0 : i32
    %c0_i32_1 = arith.constant 0 : i32
    return %c0_i32, %c0_i32_0 : i32, i32
  }
  func.func @transform_4(%arg0: i32) -> (i32, i32) {
    %c0_i32 = arith.constant 0 : i32
    %c0_i32_0 = arith.constant 0 : i32
    %c0_i32_1 = arith.constant 0 : i32
    return %c0_i32, %c0_i32_0 : i32, i32
  }
  func.func @transform_5(%arg0: i32) -> (i32, i32) {
    %c0_i32 = arith.constant 0 : i32
    %c0_i32_0 = arith.constant 0 : i32
    %c0_i32_1 = arith.constant 0 : i32
    return %c0_i32, %c0_i32_0 : i32, i32
  }
  func.func @transform_6(%arg0: i32) -> (i32, i32) {
    %c0_i32 = arith.constant 0 : i32
    %c0_i32_0 = arith.constant 0 : i32
    %c0_i32_1 = arith.constant 0 : i32
    return %c0_i32, %c0_i32_0 : i32, i32
  }
  func.func @transform_7(%arg0: i32) -> (i32, i32) {
    %c0_i32 = arith.constant 0 : i32
    %c0_i32_0 = arith.constant 0 : i32
    %c0_i32_1 = arith.constant 0 : i32
    return %c0_i32, %c0_i32_0 : i32, i32
  }
  func.func @transform_8(%arg0: i32) -> (i32, i32) {
    %c0_i32 = arith.constant 0 : i32
    %c0_i32_0 = arith.constant 0 : i32
    %c0_i32_1 = arith.constant 0 : i32
    return %c0_i32, %c0_i32_0 : i32, i32
  }
  func.func @transform_9(%arg0: i32) -> (i32, i32) {
    %c0_i32 = arith.constant 0 : i32
    %c0_i32_0 = arith.constant 0 : i32
    %c0_i32_1 = arith.constant 0 : i32
    return %c0_i32, %c0_i32_0 : i32, i32
  }
  func.func @transform_10(%arg0: i32) -> (i32, i32) {
    %c0_i32 = arith.constant 0 : i32
    %c0_i32_0 = arith.constant 0 : i32
    %c0_i32_1 = arith.constant 0 : i32
    return %c0_i32, %c0_i32_0 : i32, i32
  }
  func.func @transform_11(%arg0: i32) -> (i32, i32) {
    %c0_i32 = arith.constant 0 : i32
    %c0_i32_0 = arith.constant 0 : i32
    %c0_i32_1 = arith.constant 0 : i32
    return %c0_i32, %c0_i32_0 : i32, i32
  }
  func.func @transform_12(%arg0: i32) -> (i32, i32, i32) {
    %c0_i32 = arith.constant 0 : i32
    %c0_i32_0 = arith.constant 0 : i32
    %c0_i32_1 = arith.constant 0 : i32
    return %arg0, %c0_i32, %c0_i32_0 : i32, i32, i32
  }
}

</mosaic_0001>

<bundles_post_ra>
// kernel: tpu_custom_call.1
= control target key start
LH: loop header
LB: loop body
LE: loop exit
PB: predicated region body
PF: predicated region fallthrough
CT: control target
= control target key end

     0   :  { %s4162_s0 = inlined_call_operand.vmem [shape: f32[2,72,8], index: 0, kind: input, shape index: {}]   ;;  %s4163_s1 = inlined_call_operand.vmem [shape: f32[2,72,1], index: 1, kind: input, shape index: {}]   ;;  %s4164_s2 = inlined_call_operand.vmem [shape: f32[2,8,16], index: 2, kind: input, shape index: {}]   ;;  %s4165_s3 = inlined_call_operand.vmem [shape: f32[8,128], index: 3, kind: input, shape index: {}]   ;;  %s4166_s4 = inlined_call_operand.vmem [shape: f32[32,128], index: 4, kind: input, shape index: {}]   ;;  %s4167_s5 = inlined_call_operand.vmem [shape: f32[1,128], index: 5, kind: input, shape index: {}]   ;;  %s4168_s6 = inlined_call_operand.vmem [shape: f32[16,128], index: 6, kind: input, shape index: {}]   ;;  %s4169_s7 = inlined_call_operand.vmem [shape: f32[32,128], index: 7, kind: input, shape index: {}]   ;;  %s4170_s8 = inlined_call_operand.vmem [shape: f32[32,128], index: 8, kind: input, shape index: {}]   ;;  %s4171_s9 = inlined_call_operand.vmem [shape: f32[1,128], index: 9, kind: input, shape index: {}]   ;;  %s4172_s10 = inlined_call_operand.vmem [shape: f32[32,128], index: 10, kind: input, shape index: {}]   ;;  %s4173_s11 = inlined_call_operand.vmem [shape: f32[1,128], index: 11, kind: input, shape index: {}]   ;;  %s4174_s12 = inlined_call_operand.hbm [shape: f32[2,8,128], index: 12, kind: output, shape index: {}]  }
   0x1   :  { %4179 = sst [smem:[#allocation6_spill]] %s4162_s0 }
   0x2   :  { %4180 = sst [smem:[#allocation7_spill]] %s4163_s1 }
   0x3   :  { %4181 = sst [smem:[#allocation8_spill]] %s4164_s2 }
   0x4   :  { %17 = vsyncpa [#allocation4], 0 }
   0x5   :  { %19 = vsyncpa [#allocation4 + $0x1], 0  ;;  %s3562_s21 = smov 0   ;;  %s3564_s22 = smov 0  }
   0x6   :  { %s3566_s23 = smov 0   ;;  %s3568_s24 = smov 0  }
   0x7 LB: > { %s3583_s25 = sadd.s32 4294967295, %s3489_s24   ;;  %s2830_s26 = sadd.s32 4294967294, %s3489_s24   ;;  %s3489_s24 = sphi %s3568_s24, %s4192_s24   ;;  %s3485_s23 = sphi %s3566_s23, %s4191_s23   ;;  %s3481_s22 = sphi %s3564_s22, %s4190_s22   ;;  %s3477_s21 = sphi %s3562_s21, %s4189_s21  }
   0x8   : > { %s3587_s27 = sadd.s32 1, %s3489_s24   ;;  %s299_s28 = sadd.s32 1, %s3485_s23 }
   0x9   : > { %s296_s29 = ssub.s32 %s3489_s24, %s3587_s27  ;;  %p309_p0 = scmp.ne.s32.totalorder %s3485_s23, %s3481_s22 }
   0xa   : > { %p297_p1 = scmp.eq.s32.totalorder %s296_s29, 0  ;;  %p310_p2 = scmp.eq.s32.totalorder %s3583_s25, 1 }
   0xb   : > { %p315_p3 = scmp.ne.s32.totalorder %s3481_s22, %s3477_s21  ;;  %p316_p4 = scmp.eq.s32.totalorder %s2830_s26, 1 }
   0xc   : > { %s3598_s30 = scalar_select %p297_p1, %s3485_s23, %s299_s28  }
   0xd   : > { %p3600_p5 = por %p310_p2, %p309_p0  ;;  %p3604_p6 = por %p316_p4, %p315_p3 }
   0xe   : > { %p2833_p7 = scmp.ge.s32.totalorder %s3489_s24, 1  ;;  %p384_p8 = scmp.lt.s32.totalorder %s3489_s24, 3 }
  0x10   : > { %p385_p9 = pnand %p2833_p7, %p384_p8 }
  0x11   : > { %p435_p10 = scmp.lt.s32.totalorder (!%p385_p9), %s3583_s25, 1  ;;  %s4184_s0 = sld [smem:[#allocation6_spill]] (!%p385_p9) }
  0x12   : > { %388 = sbr.rel (%p385_p9) target bundleno = 12316 (0x301c), region = 68  ;;  %s4185_s1 = sld [smem:[#allocation7_spill]] (!%p385_p9) }
  0x13   : > { %s4175_s19 = smov (!%p385_p9), 32   ;;  %s4187_s2 = sld [smem:[#allocation8_spill]] (!%p385_p9) }
  0x14   : > { %s2886_s18 = sshll.u32 (!%p385_p9), %s3583_s25, 7 }
  0x17   : > { %v3613_v0 = vld [vmem:[%s4166_s4 + $0x18] sm:$0xff]  ;;  %v3491_v1 = vmov 0.0   ;;  %v3620_v2 = vld [vmem:[%s4166_s4 + $0x10] sm:$0xff]  ;;  %v458_v3 = vld [vmem:[%s4165_s3] sm:$0xff]  ;;  %s3628_s26 = scalar_select %p435_p10, %s3583_s25, 1  ;;  %vm3492_vm0 = vmmov 0  }
  0x18   : > { %3026 = vmatprep.subr.mxu1 %v3491_v1  ;;  %2997 = vmatprep.subr.mxu0 %v3491_v1  ;;  %v3634_v4 = vld [vmem:[%s4166_s4 + $0x8] sm:$0xff]  ;;  %vm466_vm1 = vcmask 64512   ;;  %v3646_v5 = vld [vmem:[%s4166_s4] sm:$0xff]  ;;  %v3493_v7 = vmov 0   ;;  %vm626_vm4 = vcmask 261120  }
  0x19   : > { %3027 = vmatpush3.msra.mxu1 %v3613_v0  ;;  %2998 = vmatpush3.msra.mxu0 %v458_v3  ;;  %s3242_s15 = smul.u32 72, %s3628_s26  ;;  %v3697_v10 = vld [vmem:[%s4167_s5] ss:$0 sm:$0xff] }
  0x1a   : > { %3028 = vmatprep.subr.mxu1 %v3491_v1  ;;  %2999 = vmatprep.mubr.msk.f32.mxu0 %vm3492_vm0, %v3491_v1 }
  0x1b   : > { %3029 = vmatpush3.msra.mxu1 %v3620_v2  ;;  %3034 = vmatprep.mubr.msk.f32.mxu1 %vm3492_vm0, %v3491_v1  ;;  %s3655_s20 = scalar_lea.vmem %s4184_s0, %s3242_s15  ;;  %s3688_s16 = scalar_lea.vmem %s4185_s1, %s3242_s15 }
  0x1c   : > { %3030 = vmatprep.subr.mxu1 %v3491_v1  ;;  %3070 = vmatprep.subr.mxu0 %v3491_v1  ;;  %v449_v6 = vld [vmem:[%s3655_s20] sm:$0xff]  ;;  %s4177_s15 = smov 64   ;;  %v450_v27 = vld [vmem:[%s3655_s20 + $0x8] sm:$0xff]  ;;  %v451_v53 = vld [vmem:[%s3655_s20 + $0x10] sm:$0xff]  ;;  %s4186_s0 = smov 64  }
  0x1d   : > { %3031 = vmatpush3.msra.mxu1 %v3634_v4  ;;  %3000 = vmatmul.mubr.msk.f32.vlgmr.msra.gmra.mxu0 %vm466_vm1, %v449_v6  ;;  %v604_v8 = vld [vmem:[%s3688_s16] sm:$0xff]  ;;  %v605_v40 = vld [vmem:[%s3688_s16 + $0x8] sm:$0xff]  ;;  %s2837_s1 = sshll.u32 %s3628_s26, 3 }
  0x1e   : > { %3032 = vmatprep.subr.mxu1 %v3491_v1  ;;  %3002 = vmatprep.mubr.msk.f32.mxu0 %vm3492_vm0, %v3491_v1  ;;  %vm613_vm2 = vcmp.ne.f32.partialorder %v604_v8, 0.0  ;;  %vm614_vm5 = vcmp.ne.f32.partialorder %v605_v40, 0.0  ;;  %v606_v8 = vld [vmem:[%s3688_s16 + $0x10] sm:$0xff]  ;;  %s448_s29 = scalar_lea.vmem %s4187_s2, %s2837_s1  ;;  %s2745_s1 = scalar_lea.hbm %s4174_s12, %s2886_s18 }
  0x1f   : > { %3033 = vmatpush3.msra.mxu1 %v3646_v5  ;;  %3071 = vmatpush3.msra.mxu0 %v3613_v0  ;;  %v725_v9 = vsel %vm613_vm2, 1, %v3493_v7  ;;  %v832_v42 = vsel %vm614_vm5, 1, %v3493_v7  ;;  %vm615_vm7 = vcmp.ne.f32.partialorder %v606_v8, 0.0 }
  0x20   : > { %3035 = vmatmul.mubr.f32.vlgmr.msra.gmra.mxu1 %v3491_v1  ;;  %3037 = vmatprep.subr.mxu1 %v3491_v1 }
  0x21   : > { %3038 = vmatpush3.msra.mxu1 %v3613_v0  ;;  %3045 = vmatprep.mubr.msk.f32.mxu1 %vm3492_vm0, %v3491_v1 }
  0x22   : > { %3039 = vmatprep.subr.mxu1 %v3491_v1  ;;  %3072 = vmatprep.subr.mxu0 %v3491_v1 }
  0x23   : > { %3040 = vmatpush3.msra.mxu1 %v3620_v2  ;;  %3073 = vmatpush3.msra.mxu0 %v3620_v2 }
  0x24   : > { %3041 = vmatprep.subr.mxu1 %v3491_v1  ;;  %3074 = vmatprep.subr.mxu0 %v3491_v1 }
  0x25   : > { %3042 = vmatpush3.msra.mxu1 %v3634_v4  ;;  %3075 = vmatpush3.msra.mxu0 %v3634_v4 }
  0x26   : > { %3043 = vmatprep.subr.mxu1 %v3491_v1  ;;  %3076 = vmatprep.subr.mxu0 %v3491_v1 }
  0x27   : > { %3044 = vmatpush3.msra.mxu1 %v3646_v5  ;;  %3077 = vmatpush3.msra.mxu0 %v3646_v5 }
  0x28   : > { %3048 = vmatprep.subr.mxu1 %v3491_v1  ;;  %3092 = vmatprep.subr.mxu0 %v3491_v1 }
  0x29   : > { %3287 = vset.pattern.permute.xlu1 %v3493_v7  ;;  %3288 = vset.pattern.permute.xlu0 %v3493_v7 }
  0x2a   : > { %727 = vperm.xlu1 %3287, %v725_v9   ;;  %3003 = vmatmul.mubr.msk.f32.gmra.mxu0 %vm466_vm1, %v450_v27 }
  0x2b   : > { %3005 = vmatprep.mubr.msk.f32.mxu0 %vm3492_vm0, %v3491_v1 }
  0x2e   : > { %3006 = vmatmul.mubr.msk.f32.gmra.mxu0 %vm466_vm1, %v451_v53  ;;  %v457_v53 = vld [vmem:[%s3655_s20 + $0x40] sm:$0xff] }
  0x2f   : > { %3008 = vmatprep.mubr.msk.f32.mxu0 %vm3492_vm0, %v3491_v1 }
  0xa5   : > { %v728_v29 = vpop.permute.xlu1 %727 }
  0xa6   : > { %vm729_vm3 = vcmp.eq.s32.totalorder %v728_v29, 1 }
  0xdd   : > { %v560_v11 = vpop.f32.mrf.mxu0 }
  0xde   : > { %v561_v12 = vadd.f32 %v3697_v10, %v560_v11  ;;  %v939_v11 = vsel %vm615_vm7, 1, %v3493_v7 }
  0xdf   : > { %v3001_v14 = vpop.f32.mrf.mxu0 }
  0xe0   : > { %v696_v13 = vpop.f32.mrf.mxu1 }
  0xe1   : > { %v700_v15 = vadd.f32 %v696_v13, %v561_v12 }
  0xe2   : > { %v3036_v16 = vpop.f32.mrf.mxu1 }
  0xe3   : > { %3289 = vtanh.f32 %v700_v15  ;;  %v2848_v18 = vmul.f32 -1.442695, %v700_v15 }
  0xe5   : > { %3291 = vpow2.f32 %v2848_v18 }
  0xea   : > { %v565_v33 = vpop.f32.mrf.mxu0 }
  0xeb   : > { %v566_v36 = vadd.f32 %v3697_v10, %v565_v33 }
  0xec   : > { %v3004_v34 = vpop.f32.mrf.mxu0 }
  0xee   : > { %v570_v59 = vpop.f32.mrf.mxu0 }
  0xef   : > { %v571_v62 = vadd.f32 %v3697_v10, %v570_v59 }
  0xf0   : > { %v3290_v17 = vpop.eup %3289  ;;  %v3007_v60 = vpop.f32.mrf.mxu0 }
  0xf1   : > { %710 = vrot.lane.b32.xlu0 %v3290_v17, %s4177_s15 }
  0xf2   : > { %v3292_v19 = vpop.eup %3291 }
  0xf3   : > { %v704_v20 = vadd.f32 1.0, %v3292_v19 }
  0xf5   : > { %3293 = vrcp.f32 %v704_v20 }
 0x102   : > { %v3294_v21 = vpop.eup %3293 }
 0x103   : > { %v708_v24 = vmul.f32 0.0, %v3294_v21 }
 0x163   : > { %v711_v22 = vpop.permute.xlu0 %710 }
 0x164   : > { %v713_v23 = vmul.f32 %v3294_v21, %v711_v22  ;;  %v452_v22 = vld [vmem:[%s3655_s20 + $0x18] sm:$0xff] }
 0x165   : > { %3009 = vmatmul.mubr.msk.f32.gmra.mxu0 %vm466_vm1, %v452_v22 }
 0x166   : > { %715 = vrot.lane.b32.xlu0 %v713_v23, %s4175_s19  ;;  %3011 = vmatprep.mubr.msk.f32.mxu0 %vm3492_vm0, %v3491_v1 }
 0x1d8   : > { %v716_v25 = vpop.permute.xlu0 %715 }
 0x1d9   : > { %v718_v26 = vadd.f32 %v716_v25, %v708_v24 }
 0x1db   : > { %3295 = vtanh.f32 %v718_v26  ;;  %v731_v49 = vsel %vm729_vm3, %v718_v26, 0.0 }
 0x1e8   : > { %v3296_v28 = vpop.eup %3295 }
 0x1e9   : > { %721 = vrot.lane.b32.xlu1 %v3296_v28, %s4177_s15 }
 0x225   : > { %v575_v28 = vpop.f32.mrf.mxu0 }
 0x227   : > { %v3010_v29 = vpop.f32.mrf.mxu0 }
 0x25b   : > { %v722_v30 = vpop.permute.xlu1 %721 }
 0x25c   : > { %v724_v31 = vmul.f32 %v3294_v21, %v722_v30 }
 0x25e   : > { %v730_v32 = vsel %vm729_vm3, %v724_v31, 0.0  ;;  %v576_v31 = vadd.f32 %v3697_v10, %v575_v28 }
 0x25f   : > { %733 = vrot.lane.b32.xlu0 %v730_v32, %s4175_s19 }
 0x2d1   : > { %v734_v35 = vpop.permute.xlu0 %733 }
 0x2d2   : > { %3046 = vmatmul.mubr.msk.f32.vlgmr.msra.gmra.mxu1 %vm626_vm4, %v734_v35  ;;  %v607_v35 = vld [vmem:[%s3688_s16 + $0x18] sm:$0xff] }
 0x2d3   : > { %3049 = vmatpush3.msra.mxu1 %v3613_v0  ;;  %3056 = vmatprep.mubr.msk.f32.mxu1 %vm3492_vm0, %v3491_v1  ;;  %vm616_vm9 = vcmp.ne.f32.partialorder %v607_v35, 0.0 }
 0x2d4   : > { %3050 = vmatprep.subr.mxu1 %v3491_v1 }
 0x2d5   : > { %3051 = vmatpush3.msra.mxu1 %v3620_v2 }
 0x2d6   : > { %3052 = vmatprep.subr.mxu1 %v3491_v1 }
 0x2d7   : > { %3053 = vmatpush3.msra.mxu1 %v3634_v4 }
 0x2d8   : > { %3054 = vmatprep.subr.mxu1 %v3491_v1 }
 0x2d9   : > { %3055 = vmatpush3.msra.mxu1 %v3646_v5 }
 0x2da   : > { %3059 = vmatprep.subr.mxu1 %v3491_v1 }
 0x392   : > { %v803_v37 = vpop.f32.mrf.mxu1 }
 0x393   : > { %v807_v38 = vadd.f32 %v803_v37, %v566_v36  ;;  %v1046_v37 = vsel %vm616_vm9, 1, %v3493_v7  ;;  %vm2187_vm9 = vcmask 257027  }
 0x394   : > { %v3047_v39 = vpop.f32.mrf.mxu1 }
 0x395   : > { %3297 = vtanh.f32 %v807_v38  ;;  %v2850_v43 = vmul.f32 -1.442695, %v807_v38 }
 0x397   : > { %3299 = vpow2.f32 %v2850_v43 }
 0x3a2   : > { %v3298_v41 = vpop.eup %3297 }
 0x3a3   : > { %817 = vrot.lane.b32.xlu1 %v3298_v41, %s4177_s15 }
 0x3a4   : > { %v3300_v44 = vpop.eup %3299 }
 0x3a5   : > { %v811_v45 = vadd.f32 1.0, %v3300_v44 }
 0x3a7   : > { %834 = vperm.xlu1 %3287, %v832_v42   ;;  %3301 = vrcp.f32 %v811_v45 }
 0x3b4   : > { %v3302_v46 = vpop.eup %3301 }
 0x3b5   : > { %v815_v50 = vmul.f32 %v3302_v46, %v731_v49 }
 0x415   : > { %v818_v47 = vpop.permute.xlu1 %817 }
 0x416   : > { %v820_v48 = vmul.f32 %v3302_v46, %v818_v47 }
 0x418   : > { %822 = vrot.lane.b32.xlu0 %v820_v48, %s4175_s19  ;;  %v453_v48 = vld [vmem:[%s3655_s20 + $0x20] sm:$0xff] }
 0x419   : > { %3012 = vmatmul.mubr.msk.f32.gmra.mxu0 %vm466_vm1, %v453_v48 }
 0x41a   : > { %3014 = vmatprep.mubr.msk.f32.mxu0 %vm3492_vm0, %v3491_v1 }
 0x422   : > { %v835_v55 = vpop.permute.xlu1 %834 }
 0x423   : > { %vm836_vm6 = vcmp.eq.s32.totalorder %v835_v55, 1 }
 0x48a   : > { %v823_v51 = vpop.permute.xlu0 %822 }
 0x48b   : > { %v825_v52 = vadd.f32 %v823_v51, %v815_v50  ;;  %v455_v50 = vld [vmem:[%s3655_s20 + $0x30] sm:$0xff] }
 0x48d   : > { %3303 = vtanh.f32 %v825_v52  ;;  %v838_v18 = vsel %vm836_vm6, %v825_v52, %v731_v49  ;;  %v454_v49 = vld [vmem:[%s3655_s20 + $0x28] sm:$0xff]  ;;  %v456_v52 = vld [vmem:[%s3655_s20 + $0x38] sm:$0xff] }
 0x48e   : > { %3015 = vmatmul.mubr.msk.f32.gmra.mxu0 %vm466_vm1, %v454_v49 }
 0x48f   : > { %3017 = vmatprep.mubr.msk.f32.mxu0 %vm3492_vm0, %v3491_v1 }
 0x492   : > { %3018 = vmatmul.mubr.msk.f32.gmra.mxu0 %vm466_vm1, %v455_v50 }
 0x493   : > { %3020 = vmatprep.mubr.msk.f32.mxu0 %vm3492_vm0, %v3491_v1 }
 0x496   : > { %3021 = vmatmul.mubr.msk.f32.gmra.mxu0 %vm466_vm1, %v456_v52 }
 0x497   : > { %3023 = vmatprep.mubr.msk.f32.mxu0 %vm3492_vm0, %v3491_v1 }
 0x49a   : > { %v3304_v54 = vpop.eup %3303  ;;  %3024 = vmatmul.mubr.msk.f32.gmra.mxu0 %vm466_vm1, %v457_v53 }
 0x49b   : > { %828 = vrot.lane.b32.xlu0 %v3304_v54, %s4177_s15  ;;  %3078 = vmatprep.mubr.msk.f32.mxu0 %vm3492_vm0, %v3491_v1 }
 0x50d   : > { %v829_v56 = vpop.permute.xlu0 %828 }
 0x50e   : > { %v831_v57 = vmul.f32 %v3302_v46, %v829_v56 }
 0x510   : > { %v837_v58 = vsel %vm836_vm6, %v831_v57, %v730_v32  ;;  %vm1669_vm6 = vcmask 130048  }
 0x511   : > { %840 = vrot.lane.b32.xlu1 %v837_v58, %s4175_s19 }
 0x583   : > { %v841_v61 = vpop.permute.xlu1 %840 }
 0x584   : > { %3057 = vmatmul.mubr.msk.f32.vlgmr.msra.gmra.mxu1 %vm626_vm4, %v841_v61 }
 0x585   : > { %3060 = vmatpush3.msra.mxu1 %v3613_v0  ;;  %3067 = vmatprep.mubr.msk.f32.mxu1 %vm3492_vm0, %v3491_v1 }
 0x586   : > { %3061 = vmatprep.subr.mxu1 %v3491_v1 }
 0x587   : > { %3062 = vmatpush3.msra.mxu1 %v3620_v2 }
 0x588   : > { %3063 = vmatprep.subr.mxu1 %v3491_v1 }
 0x589   : > { %3064 = vmatpush3.msra.mxu1 %v3634_v4 }
 0x58a   : > { %3065 = vmatprep.subr.mxu1 %v3491_v1 }
 0x58b   : > { %3066 = vmatpush3.msra.mxu1 %v3646_v5 }
 0x58c   : > { %3081 = vmatprep.subr.mxu1 %v3491_v1 }
 0x644   : > { %v910_v63 = vpop.f32.mrf.mxu1 }
 0x645   : > { %v914_v3 = vadd.f32 %v910_v63, %v571_v62 }
 0x646   : > { %v3058_v6 = vpop.f32.mrf.mxu1 }
 0x647   : > { %3305 = vtanh.f32 %v914_v3  ;;  %v2852_v12 = vmul.f32 -1.442695, %v914_v3 }
 0x649   : > { %3307 = vpow2.f32 %v2852_v12 }
 0x654   : > { %v3306_v9 = vpop.eup %3305 }
 0x655   : > { %924 = vrot.lane.b32.xlu0 %v3306_v9, %s4177_s15 }
 0x656   : > { %v3308_v13 = vpop.eup %3307 }
 0x657   : > { %v918_v14 = vadd.f32 1.0, %v3308_v13 }
 0x659   : > { %941 = vperm.xlu0 %3288, %v939_v11   ;;  %3309 = vrcp.f32 %v918_v14 }
 0x666   : > { %v3310_v15 = vpop.eup %3309 }
 0x667   : > { %v922_v19 = vmul.f32 %v3310_v15, %v838_v18 }
 0x6c7   : > { %v925_v16 = vpop.permute.xlu0 %924 }
 0x6c8   : > { %v927_v17 = vmul.f32 %v3310_v15, %v925_v16  ;;  %v608_v16 = vld [vmem:[%s3688_s16 + $0x20] sm:$0xff] }
 0x6c9   : > { %vm617_vm11 = vcmp.ne.f32.partialorder %v608_v16, 0.0 }
 0x6ca   : > { %929 = vrot.lane.b32.xlu1 %v927_v17, %s4175_s19 }
 0x6d4   : > { %v942_v24 = vpop.permute.xlu0 %941 }
 0x6d5   : > { %vm943_vm8 = vcmp.eq.s32.totalorder %v942_v24, 1 }
 0x73c   : > { %v930_v20 = vpop.permute.xlu1 %929 }
 0x73d   : > { %v932_v21 = vadd.f32 %v930_v20, %v922_v19 }
 0x73f   : > { %3311 = vtanh.f32 %v932_v21  ;;  %v3774_v44 = vsel %vm943_vm8, %v932_v21, %v838_v18  ;;  %v1153_v18 = vsel %vm617_vm11, 1, %v3493_v7  ;;  %vm2075_vm11 = vcmask 256002  }
 0x74c   : > { %v3312_v23 = vpop.eup %3311 }
 0x74d   : > { %935 = vrot.lane.b32.xlu1 %v3312_v23, %s4177_s15 }
 0x7bf   : > { %v936_v25 = vpop.permute.xlu1 %935 }
 0x7c0   : > { %v938_v26 = vmul.f32 %v3310_v15, %v936_v25 }
 0x7c2   : > { %v944_v27 = vsel %vm943_vm8, %v938_v26, %v837_v58  ;;  %v580_v58 = vpop.f32.mrf.mxu0  ;;  %vm1854_vm8 = vcmask 253952  }
 0x7c3   : > { %947 = vrot.lane.b32.xlu1 %v944_v27, %s4175_s19  ;;  %v581_v12 = vadd.f32 %v3697_v10, %v580_v58 }
 0x7c4   : > { %v3013_v59 = vpop.f32.mrf.mxu0 }
 0x7c6   : > { %v3803_v60 = vpop.f32.mrf.mxu0 }
 0x7c7   : > { %v586_v35 = vadd.f32 %v3697_v10, %v3803_v60 }
 0x7c8   : > { %v3016_v61 = vpop.f32.mrf.mxu0 }
 0x7c9   : > { %v610_v61 = vld [vmem:[%s3688_s16 + $0x30] sm:$0xff] }
 0x7ca   : > { %v3805_v62 = vpop.f32.mrf.mxu0  ;;  %vm619_vm15 = vcmp.ne.f32.partialorder %v610_v61, 0.0  ;;  %v1591_v61 = vld [vmem:[%s4169_s7 + $0x8] sm:$0xff] }
 0x7cc   : > { %v3019_v63 = vpop.f32.mrf.mxu0 }
 0x7ce   : > { %v3807_v3 = vpop.f32.mrf.mxu0 }
 0x7d0   : > { %v3022_v6 = vpop.f32.mrf.mxu0 }
 0x7d2   : > { %v3809_v8 = vpop.f32.mrf.mxu0 }
 0x7d4   : > { %v3025_v9 = vpop.f32.mrf.mxu0 }
 0x835   : > { %v948_v30 = vpop.permute.xlu1 %947 }
 0x836   : > { %3068 = vmatmul.mubr.msk.f32.vlgmr.msra.gmra.mxu1 %vm626_vm4, %v948_v30 }
 0x837   : > { %3082 = vmatpush3.msra.mxu1 %v3613_v0  ;;  %3089 = vmatprep.mubr.msk.f32.mxu1 %vm3492_vm0, %v3491_v1 }
 0x838   : > { %3083 = vmatprep.subr.mxu1 %v3491_v1 }
 0x839   : > { %3084 = vmatpush3.msra.mxu1 %v3620_v2 }
 0x83a   : > { %3085 = vmatprep.subr.mxu1 %v3491_v1 }
 0x83b   : > { %3086 = vmatpush3.msra.mxu1 %v3634_v4 }
 0x83c   : > { %3087 = vmatprep.subr.mxu1 %v3491_v1 }
 0x83d   : > { %3088 = vmatpush3.msra.mxu1 %v3646_v5 }
 0x83e   : > { %3103 = vmatprep.subr.mxu1 %v3491_v1 }
 0x8f6   : > { %v1017_v32 = vpop.f32.mrf.mxu1 }
 0x8f7   : > { %v1021_v33 = vadd.f32 %v1017_v32, %v576_v31 }
 0x8f8   : > { %v3069_v34 = vpop.f32.mrf.mxu1 }
 0x8f9   : > { %3313 = vtanh.f32 %v1021_v33  ;;  %v2854_v38 = vmul.f32 -1.442695, %v1021_v33 }
 0x8fb   : > { %3315 = vpow2.f32 %v2854_v38 }
 0x906   : > { %v3314_v36 = vpop.eup %3313 }
 0x907   : > { %1031 = vrot.lane.b32.xlu0 %v3314_v36, %s4177_s15 }
 0x908   : > { %v3316_v39 = vpop.eup %3315 }
 0x909   : > { %v1025_v40 = vadd.f32 1.0, %v3316_v39  ;;  %v609_v39 = vld [vmem:[%s3688_s16 + $0x28] sm:$0xff] }
 0x90a   : > { %vm618_vm13 = vcmp.ne.f32.partialorder %v609_v39, 0.0 }
 0x90b   : > { %1048 = vperm.xlu0 %3288, %v1046_v37   ;;  %3317 = vrcp.f32 %v1025_v40 }
 0x918   : > { %v3318_v41 = vpop.eup %3317 }
 0x919   : > { %v1029_v45 = vmul.f32 %v3318_v41, %v3774_v44 }
 0x979   : > { %v1032_v42 = vpop.permute.xlu0 %1031 }
 0x97a   : > { %v1034_v43 = vmul.f32 %v3318_v41, %v1032_v42 }
 0x97c   : > { %1036 = vrot.lane.b32.xlu1 %v1034_v43, %s4175_s19 }
 0x986   : > { %v1049_v54 = vpop.permute.xlu0 %1048 }
 0x987   : > { %vm1050_vm10 = vcmp.eq.s32.totalorder %v1049_v54, 1 }
 0x9ee   : > { %v1037_v46 = vpop.permute.xlu1 %1036 }
 0x9ef   : > { %v3777_v47 = vadd.f32 %v1037_v46, %v1029_v45 }
 0x9f1   : > { %3319 = vtanh.f32 %v3777_v47  ;;  %v1052_v25 = vsel %vm1050_vm10, %v3777_v47, %v3774_v44 }
 0x9fe   : > { %v3320_v51 = vpop.eup %3319 }
 0x9ff   : > { %1042 = vrot.lane.b32.xlu1 %v3320_v51, %s4177_s15 }
 0xa71   : > { %v1043_v55 = vpop.permute.xlu1 %1042 }
 0xa72   : > { %v1045_v56 = vmul.f32 %v3318_v41, %v1043_v55  ;;  %v1260_v41 = vsel %vm618_vm13, 1, %v3493_v7  ;;  %vm2523_vm13 = vcmask 260102  }
 0xa74   : > { %v1051_v57 = vsel %vm1050_vm10, %v1045_v56, %v944_v27  ;;  %vm2411_vm10 = vcmask 259077  }
 0xa75   : > { %1054 = vrot.lane.b32.xlu0 %v1051_v57, %s4175_s19 }
 0xae7   : > { %v1055_v11 = vpop.permute.xlu0 %1054 }
 0xae8   : > { %3079 = vmatmul.mubr.msk.f32.vlgmr.msra.gmra.mxu0 %vm626_vm4, %v1055_v11 }
 0xae9   : > { %3093 = vmatpush3.msra.mxu0 %v3613_v0  ;;  %3100 = vmatprep.mubr.msk.f32.mxu0 %vm3492_vm0, %v3491_v1 }
 0xaea   : > { %3094 = vmatprep.subr.mxu0 %v3491_v1 }
 0xaeb   : > { %3095 = vmatpush3.msra.mxu0 %v3620_v2 }
 0xaec   : > { %3096 = vmatprep.subr.mxu0 %v3491_v1 }
 0xaed   : > { %3097 = vmatpush3.msra.mxu0 %v3634_v4 }
 0xaee   : > { %3098 = vmatprep.subr.mxu0 %v3491_v1 }
 0xaef   : > { %3099 = vmatpush3.msra.mxu0 %v3646_v5 }
 0xaf0   : > { %3114 = vmatprep.subr.mxu0 %v3491_v1 }
 0xba8   : > { %v1124_v13 = vpop.f32.mrf.mxu0 }
 0xba9   : > { %v1128_v14 = vadd.f32 %v1124_v13, %v581_v12 }
 0xbaa   : > { %v3080_v15 = vpop.f32.mrf.mxu0 }
 0xbab   : > { %3321 = vtanh.f32 %v1128_v14  ;;  %v2856_v19 = vmul.f32 -1.442695, %v1128_v14 }
 0xbad   : > { %3323 = vpow2.f32 %v2856_v19 }
 0xbb8   : > { %v3322_v17 = vpop.eup %3321 }
 0xbb9   : > { %1138 = vrot.lane.b32.xlu1 %v3322_v17, %s4177_s15 }
 0xbba   : > { %v3324_v20 = vpop.eup %3323 }
 0xbbb   : > { %v1132_v21 = vadd.f32 1.0, %v3324_v20 }
 0xbbd   : > { %1155 = vperm.xlu1 %3287, %v1153_v18   ;;  %3325 = vrcp.f32 %v1132_v21 }
 0xbca   : > { %v3326_v22 = vpop.eup %3325 }
 0xbcb   : > { %v1136_v26 = vmul.f32 %v3326_v22, %v1052_v25 }
 0xc2b   : > { %v1139_v23 = vpop.permute.xlu1 %1138 }
 0xc2c   : > { %v1141_v24 = vmul.f32 %v3326_v22, %v1139_v23 }
 0xc2e   : > { %1143 = vrot.lane.b32.xlu0 %v1141_v24, %s4175_s19 }
 0xc38   : > { %v1156_v30 = vpop.permute.xlu1 %1155 }
 0xc39   : > { %vm1157_vm12 = vcmp.eq.s32.totalorder %v1156_v30, 1 }
 0xca0   : > { %v1144_v27 = vpop.permute.xlu0 %1143 }
 0xca1   : > { %v1146_v28 = vadd.f32 %v1144_v27, %v1136_v26  ;;  %v611_v26 = vld [vmem:[%s3688_s16 + $0x38] sm:$0xff] }
 0xca2   : > { %vm620_vm2 = vcmp.ne.f32.partialorder %v611_v26, 0.0 }
 0xca3   : > { %3327 = vtanh.f32 %v1146_v28  ;;  %v1159_v48 = vsel %vm1157_vm12, %v1146_v28, %v1052_v25  ;;  %v1474_v28 = vsel %vm620_vm2, 1, %v3493_v7 }
 0xcb0   : > { %v3328_v29 = vpop.eup %3327 }
 0xcb1   : > { %1149 = vrot.lane.b32.xlu0 %v3328_v29, %s4177_s15 }
 0xd23   : > { %v1150_v31 = vpop.permute.xlu0 %1149 }
 0xd24   : > { %v1152_v32 = vmul.f32 %v3326_v22, %v1150_v31  ;;  %v596_v22 = vadd.f32 %v3697_v10, %v3807_v3 }
 0xd26   : > { %v1158_v33 = vsel %vm1157_vm12, %v1152_v32, %v1051_v57  ;;  %vm2299_vm12 = vcmask 258052  }
 0xd27   : > { %1161 = vrot.lane.b32.xlu1 %v1158_v33, %s4175_s19 }
 0xd99   : > { %v1162_v34 = vpop.permute.xlu1 %1161 }
 0xd9a   : > { %3090 = vmatmul.mubr.msk.f32.vlgmr.msra.gmra.mxu1 %vm626_vm4, %v1162_v34 }
 0xd9b   : > { %3104 = vmatpush3.msra.mxu1 %v3613_v0  ;;  %3111 = vmatprep.mubr.msk.f32.mxu1 %vm3492_vm0, %v3491_v1 }
 0xd9c   : > { %3105 = vmatprep.subr.mxu1 %v3491_v1 }
 0xd9d   : > { %3106 = vmatpush3.msra.mxu1 %v3620_v2 }
 0xd9e   : > { %3107 = vmatprep.subr.mxu1 %v3491_v1 }
 0xd9f   : > { %3108 = vmatpush3.msra.mxu1 %v3634_v4 }
 0xda0   : > { %3109 = vmatprep.subr.mxu1 %v3491_v1 }
 0xda1   : > { %3110 = vmatpush3.msra.mxu1 %v3646_v5 }
 0xda2   : > { %3125 = vmatprep.subr.mxu1 %v3491_v1 }
 0xe5a   : > { %v1231_v36 = vpop.f32.mrf.mxu1 }
 0xe5b   : > { %v1235_v37 = vadd.f32 %v1231_v36, %v586_v35 }
 0xe5c   : > { %v3091_v38 = vpop.f32.mrf.mxu1 }
 0xe5d   : > { %3329 = vtanh.f32 %v1235_v37  ;;  %v2858_v42 = vmul.f32 -1.442695, %v1235_v37 }
 0xe5f   : > { %3331 = vpow2.f32 %v2858_v42 }
 0xe6a   : > { %v3330_v40 = vpop.eup %3329 }
 0xe6b   : > { %1245 = vrot.lane.b32.xlu0 %v3330_v40, %s4177_s15 }
 0xe6c   : > { %v3332_v43 = vpop.eup %3331 }
 0xe6d   : > { %v1239_v44 = vadd.f32 1.0, %v3332_v43 }
 0xe6f   : > { %1262 = vperm.xlu0 %3288, %v1260_v41   ;;  %3333 = vrcp.f32 %v1239_v44  ;;  %v601_v44 = vadd.f32 %v3697_v10, %v3809_v8 }
 0xe7c   : > { %v3334_v45 = vpop.eup %3333 }
 0xe7d   : > { %v1243_v49 = vmul.f32 %v3334_v45, %v1159_v48 }
 0xedd   : > { %v1246_v46 = vpop.permute.xlu0 %1245 }
 0xede   : > { %v1248_v47 = vmul.f32 %v3334_v45, %v1246_v46 }
 0xee0   : > { %1250 = vrot.lane.b32.xlu1 %v1248_v47, %s4175_s19 }
 0xeea   : > { %v1263_v53 = vpop.permute.xlu0 %1262 }
 0xeeb   : > { %vm1264_vm14 = vcmp.eq.s32.totalorder %v1263_v53, 1 }
 0xf52   : > { %v1251_v50 = vpop.permute.xlu1 %1250 }
 0xf53   : > { %v1253_v51 = vadd.f32 %v1251_v50, %v1243_v49 }
 0xf55   : > { %3335 = vtanh.f32 %v1253_v51  ;;  %v1266_v12 = vsel %vm1264_vm14, %v1253_v51, %v1159_v48  ;;  %v612_v48 = vld [vmem:[%s3688_s16 + $0x40] sm:$0xff]  ;;  %s3496_s16 = smov [#allocation3]  }
 0xf56   : > { %vm621_vm5 = vcmp.ne.f32.partialorder %v612_v48, 0.0  ;;  %s3433_s2 = sshll.u32 %s3496_s16, 4  ;;  %s3434_s2 = int_to_ptr.vmem [resolvable:$false] %s3433_s2 }
 0xf57   : > { %v1581_v50 = vsel %vm621_vm5, 1, %v3493_v7  ;;  %s3435_s25 = scalar_lea.vmem %s3434_s2, 256 }
 0xf62   : > { %v3336_v52 = vpop.eup %3335 }
 0xf63   : > { %1256 = vrot.lane.b32.xlu1 %v3336_v52, %s4177_s15 }
 0xfd5   : > { %v1257_v54 = vpop.permute.xlu1 %1256 }
 0xfd6   : > { %v1259_v55 = vmul.f32 %v3334_v45, %v1257_v54 }
 0xfd8   : > { %v1265_v56 = vsel %vm1264_vm14, %v1259_v55, %v1158_v33  ;;  %vm2635_vm14 = vcmask 261127  }
 0xfd9   : > { %1268 = vrot.lane.b32.xlu0 %v1265_v56, %s4175_s19 }
0x104b   : > { %v1269_v57 = vpop.permute.xlu0 %1268 }
0x104c   : > { %3101 = vmatmul.mubr.msk.f32.vlgmr.msra.gmra.mxu0 %vm626_vm4, %v1269_v57 }
0x104d   : > { %3115 = vmatpush3.msra.mxu0 %v3613_v0  ;;  %3122 = vmatprep.mubr.msk.f32.mxu0 %vm3492_vm0, %v3491_v1  ;;  %v591_v0 = vadd.f32 %v3697_v10, %v3805_v62 }
0x104e   : > { %3116 = vmatprep.subr.mxu0 %v3491_v1 }
0x104f   : > { %3117 = vmatpush3.msra.mxu0 %v3620_v2 }
0x1050   : > { %3118 = vmatprep.subr.mxu0 %v3491_v1 }
0x1051   : > { %3119 = vmatpush3.msra.mxu0 %v3634_v4  ;;  %v1367_v4 = vsel %vm619_vm15, 1, %v3493_v7  ;;  %v1593_v7 = vld [vmem:[%s4169_s7 + $0x18] sm:$0xff] }
0x1052   : > { %3120 = vmatprep.subr.mxu0 %v3491_v1 }
0x1053   : > { %3121 = vmatpush3.msra.mxu0 %v3646_v5 }
0x1054   : > { %3136 = vmatprep.subr.mxu0 %v3491_v1 }
0x110c   : > { %v1338_v58 = vpop.f32.mrf.mxu0 }
0x110d   : > { %v1342_v59 = vadd.f32 %v1338_v58, %v591_v0  ;;  %v1592_v58 = vld [vmem:[%s4169_s7 + $0x10] sm:$0xff] }
0x110e   : > { %v3102_v60 = vpop.f32.mrf.mxu0 }
0x110f   : > { %3337 = vtanh.f32 %v1342_v59  ;;  %v2860_v63 = vmul.f32 -1.442695, %v1342_v59  ;;  %v1589_v59 = vld [vmem:[%s4168_s6 + $0x8] sm:$0xff]  ;;  %v1588_v60 = vld [vmem:[%s4168_s6] sm:$0xff] }
0x1111   : > { %3339 = vpow2.f32 %v2860_v63  ;;  %v1587_v63 = vld [vmem:[%s448_s29] sm:$0xff] }
0x111c   : > { %v3338_v2 = vpop.eup %3337 }
0x111d   : > { %1352 = vrot.lane.b32.xlu1 %v3338_v2, %s4177_s15  ;;  %v1590_v2 = vld [vmem:[%s4169_s7] sm:$0xff] }
0x111e   : > { %v3340_v5 = vpop.eup %3339 }
0x111f   : > { %v1346_v6 = vadd.f32 1.0, %v3340_v5  ;;  %v3933_v5 = vld [vmem:[%s4170_s8 + $0x18] sm:$0xff] }
0x1121   : > { %1369 = vperm.xlu1 %3287, %v1367_v4   ;;  %3341 = vrcp.f32 %v1346_v6  ;;  %v3941_v6 = vld [vmem:[%s4170_s8 + $0x10] sm:$0xff] }
0x112e   : > { %v3342_v9 = vpop.eup %3341 }
0x112f   : > { %v1350_v13 = vmul.f32 %v3342_v9, %v1266_v12 }
0x118f   : > { %v1353_v11 = vpop.permute.xlu1 %1352 }
0x1190   : > { %v1355_v62 = vmul.f32 %v3342_v9, %v1353_v11  ;;  %v3955_v11 = vld [vmem:[%s4170_s8] sm:$0xff] }
0x1192   : > { %1357 = vrot.lane.b32.xlu0 %v1355_v62, %s4175_s19 }
0x119c   : > { %v1370_v17 = vpop.permute.xlu1 %1369 }
0x119d   : > { %vm1371_vm1 = vcmp.eq.s32.totalorder %v1370_v17, 1 }
0x1204   : > { %v1358_v14 = vpop.permute.xlu0 %1357 }
0x1205   : > { %v1360_v15 = vadd.f32 %v1358_v14, %v1350_v13 }
0x1207   : > { %3343 = vtanh.f32 %v1360_v15  ;;  %v1373_v34 = vsel %vm1371_vm1, %v1360_v15, %v1266_v12 }
0x1214   : > { %v3344_v16 = vpop.eup %3343 }
0x1215   : > { %1363 = vrot.lane.b32.xlu0 %v3344_v16, %s4177_s15 }
0x1287   : > { %v1364_v18 = vpop.permute.xlu0 %1363 }
0x1288   : > { %v1366_v19 = vmul.f32 %v3342_v9, %v1364_v18  ;;  %v3948_v9 = vld [vmem:[%s4170_s8 + $0x8] sm:$0xff] }
0x128a   : > { %v1372_v20 = vsel %vm1371_vm1, %v1366_v19, %v1265_v56 }
0x128b   : > { %1375 = vrot.lane.b32.xlu1 %v1372_v20, %s4175_s19 }
0x12fd   : > { %v1376_v21 = vpop.permute.xlu1 %1375 }
0x12fe   : > { %3112 = vmatmul.mubr.msk.f32.vlgmr.msra.gmra.mxu1 %vm626_vm4, %v1376_v21  ;;  %v2867_v21 = vld [vmem:[%s4171_s9] ss:$0 sm:$0xff] }
0x12ff   : > { %3133 = vmatprep.mubr.msk.f32.mxu1 %vm3492_vm0, %v3491_v1  ;;  %3126 = vmatpush3.msra.mxu1 %v1593_v7 }
0x1300   : > { %3127 = vmatprep.subr.mxu1 %v3491_v1 }
0x1301   : > { %3128 = vmatpush3.msra.mxu1 %v1592_v58 }
0x1302   : > { %3129 = vmatprep.subr.mxu1 %v3491_v1 }
0x1303   : > { %3130 = vmatpush3.msra.mxu1 %v1591_v61 }
0x1304   : > { %3131 = vmatprep.subr.mxu1 %v3491_v1 }
0x1305   : > { %3132 = vmatpush3.msra.mxu1 %v1590_v2 }
0x1306   : > { %3143 = vmatprep.subr.mxu1 %v3491_v1 }
0x13be   : > { %v1445_v23 = vpop.f32.mrf.mxu1 }
0x13bf   : > { %v1449_v24 = vadd.f32 %v1445_v23, %v596_v22 }
0x13c0   : > { %v3113_v25 = vpop.f32.mrf.mxu1 }
0x13c1   : > { %3345 = vtanh.f32 %v1449_v24  ;;  %v2862_v29 = vmul.f32 -1.442695, %v1449_v24 }
0x13c3   : > { %3347 = vpow2.f32 %v2862_v29 }
0x13ce   : > { %v3346_v27 = vpop.eup %3345 }
0x13cf   : > { %1459 = vrot.lane.b32.xlu0 %v3346_v27, %s4177_s15 }
0x13d0   : > { %v3348_v30 = vpop.eup %3347 }
0x13d1   : > { %v1453_v31 = vadd.f32 1.0, %v3348_v30 }
0x13d3   : > { %1476 = vperm.xlu0 %3288, %v1474_v28   ;;  %3349 = vrcp.f32 %v1453_v31 }
0x13e0   : > { %v3350_v32 = vpop.eup %3349 }
0x13e1   : > { %v1457_v35 = vmul.f32 %v3350_v32, %v1373_v34 }
0x1441   : > { %v1460_v33 = vpop.permute.xlu0 %1459 }
0x1442   : > { %v1462_v3 = vmul.f32 %v3350_v32, %v1460_v33 }
0x1444   : > { %1464 = vrot.lane.b32.xlu1 %v1462_v3, %s4175_s19 }
0x144e   : > { %v1477_v39 = vpop.permute.xlu0 %1476 }
0x144f   : > { %vm1478_vm3 = vcmp.eq.s32.totalorder %v1477_v39, 1 }
0x14b6   : > { %v1465_v36 = vpop.permute.xlu1 %1464 }
0x14b7   : > { %v1467_v37 = vadd.f32 %v1465_v36, %v1457_v35 }
0x14b9   : > { %3351 = vtanh.f32 %v1467_v37  ;;  %v1480_v8 = vsel %vm1478_vm3, %v1467_v37, %v1373_v34 }
0x14c6   : > { %v3352_v38 = vpop.eup %3351 }
0x14c7   : > { %1470 = vrot.lane.b32.xlu1 %v3352_v38, %s4177_s15 }
0x1539   : > { %v1471_v40 = vpop.permute.xlu1 %1470 }
0x153a   : > { %v1473_v41 = vmul.f32 %v3350_v32, %v1471_v40 }
0x153c   : > { %v3887_v42 = vsel %vm1478_vm3, %v1473_v41, %v1372_v20 }
0x153d   : > { %1482 = vrot.lane.b32.xlu0 %v3887_v42, %s4175_s19 }
0x15af   : > { %v1483_v43 = vpop.permute.xlu0 %1482 }
0x15b0   : > { %3123 = vmatmul.mubr.msk.f32.vlgmr.msra.gmra.mxu0 %vm626_vm4, %v1483_v43 }
0x15b1   : > { %3140 = vmatprep.mubr.msk.f32.mxu0 %vm3492_vm0, %v3491_v1  ;;  %3137 = vmatpush3.msra.mxu0 %v1589_v59 }
0x15b2   : > { %3138 = vmatprep.subr.mxu0 %v3491_v1 }
0x15b3   : > { %3139 = vmatpush3.msra.mxu0 %v1588_v60 }
0x15b4   : > { %3154 = vmatprep.subr.mxu0 %v3491_v1  ;;  %3141 = vmatmul.mubr.msk.f32.vlgmr.msra.gmra.mxu0 %vm1669_vm6, %v1587_v63 }
0x15b5   : > { %3155 = vmatpush3.msra.mxu0 %v3933_v5  ;;  %3162 = vmatprep.mubr.msk.f32.mxu0 %vm3492_vm0, %v3491_v1 }
0x15b6   : > { %3156 = vmatprep.subr.mxu0 %v3491_v1 }
0x15b7   : > { %3157 = vmatpush3.msra.mxu0 %v3941_v6 }
0x15b8   : > { %3158 = vmatprep.subr.mxu0 %v3491_v1 }
0x15b9   : > { %3159 = vmatpush3.msra.mxu0 %v3948_v9 }
0x15ba   : > { %3160 = vmatprep.subr.mxu0 %v3491_v1 }
0x15bb   : > { %3161 = vmatpush3.msra.mxu0 %v3955_v11 }
0x15bc   : > { %3176 = vmatprep.subr.mxu0 %v3491_v1 }
0x1670   : > { %v1552_v45 = vpop.f32.mrf.mxu0 }
0x1671   : > { %v1556_v46 = vadd.f32 %v1552_v45, %v601_v44 }
0x1672   : > { %v3124_v47 = vpop.f32.mrf.mxu0 }
0x1673   : > { %3353 = vtanh.f32 %v1556_v46  ;;  %v2864_v51 = vmul.f32 -1.442695, %v1556_v46 }
0x1674   : > { %v1739_v16 = vpop.f32.mrf.mxu0 }
0x1675   : > { %3355 = vpow2.f32 %v2864_v51 }
0x1676   : > { %v3142_v17 = vpop.f32.mrf.mxu0 }
0x1680   : > { %v3354_v49 = vpop.eup %3353 }
0x1681   : > { %1566 = vrot.lane.b32.xlu1 %v3354_v49, %s4177_s15 }
0x1682   : > { %v3356_v52 = vpop.eup %3355 }
0x1683   : > { %v1560_v53 = vadd.f32 1.0, %v3356_v52 }
0x1685   : > { %1583 = vperm.xlu1 %3287, %v1581_v50   ;;  %3357 = vrcp.f32 %v1560_v53 }
0x1692   : > { %v3358_v54 = vpop.eup %3357 }
0x1693   : > { %v1564_v56 = vmul.f32 %v3358_v54, %v1480_v8 }
0x16f3   : > { %v1567_v55 = vpop.permute.xlu1 %1566 }
0x16f4   : > { %v1569_v10 = vmul.f32 %v3358_v54, %v1567_v55 }
0x16f6   : > { %1571 = vrot.lane.b32.xlu0 %v1569_v10, %s4175_s19  ;;  %s4188_s19 = smov 32  }
0x1700   : > { %v1584_v62 = vpop.permute.xlu1 %1583 }
0x1701   : > { %vm1585_vm7 = vcmp.eq.s32.totalorder %v1584_v62, 1 }
0x1768   : > { %v1572_v57 = vpop.permute.xlu0 %1571 }
0x1769   : > { %v1574_v0 = vadd.f32 %v1572_v57, %v1564_v56 }
0x176b   : > { %3359 = vtanh.f32 %v1574_v0 }
0x1778   : > { %v3360_v4 = vpop.eup %3359 }
0x1779   : > { %1577 = vrot.lane.b32.xlu0 %v3360_v4, %s4186_s0 }
0x17eb   : > { %v1578_v12 = vpop.permute.xlu0 %1577 }
0x17ec   : > { %v1580_v13 = vmul.f32 %v3358_v54, %v1578_v12 }
0x17ee   : > { %v1586_v14 = vsel %vm1585_vm7, %v1580_v13, %v3887_v42 }
0x17ef   : > { %1595 = vrot.lane.b32.xlu1 %v1586_v14, %s4188_s19 }
0x1861   : > { %v1596_v15 = vpop.permute.xlu1 %1595 }
0x1862   : > { %3134 = vmatmul.mubr.msk.f32.vlgmr.msra.gmra.mxu1 %vm626_vm4, %v1596_v15 }
0x1863   : > { %3144 = vmatpush3.msra.mxu1 %v3933_v5  ;;  %3151 = vmatprep.mubr.msk.f32.mxu1 %vm3492_vm0, %v3491_v1 }
0x1864   : > { %3145 = vmatprep.subr.mxu1 %v3491_v1 }
0x1865   : > { %3146 = vmatpush3.msra.mxu1 %v3941_v6 }
0x1866   : > { %3147 = vmatprep.subr.mxu1 %v3491_v1 }
0x1867   : > { %3148 = vmatpush3.msra.mxu1 %v3948_v9 }
0x1868   : > { %3149 = vmatprep.subr.mxu1 %v3491_v1 }
0x1869   : > { %3150 = vmatpush3.msra.mxu1 %v3955_v11 }
0x186a   : > { %3152 = vmatmul.mubr.f32.vlgmr.msra.gmra.mxu1 %v3491_v1  ;;  %3165 = vmatprep.subr.mxu1 %v3491_v1 }
0x186b   : > { %3166 = vmatpush3.msra.mxu1 %v3933_v5  ;;  %3173 = vmatprep.mubr.msk.f32.mxu1 %vm3492_vm0, %v3491_v1 }
0x186c   : > { %3167 = vmatprep.subr.mxu1 %v3491_v1 }
0x186d   : > { %3168 = vmatpush3.msra.mxu1 %v3941_v6 }
0x186e   : > { %3169 = vmatprep.subr.mxu1 %v3491_v1 }
0x186f   : > { %3170 = vmatpush3.msra.mxu1 %v3948_v9 }
0x1870   : > { %3171 = vmatprep.subr.mxu1 %v3491_v1 }
0x1871   : > { %3172 = vmatpush3.msra.mxu1 %v3955_v11 }
0x1872   : > { %3187 = vmatprep.subr.mxu1 %v3491_v1 }
0x1922   : > { %v1665_v18 = vpop.f32.mrf.mxu1 }
0x1923   : > { %v1740_v20 = vadd.f32 %v1739_v16, %v1665_v18 }
0x1924   : > { %v3135_v19 = vpop.f32.mrf.mxu1 }
0x1925   : > { %v3987_v22 = vadd.f32 %v2867_v21, %v1740_v20 }
0x192a   : > { %v1821_v23 = vpop.f32.mrf.mxu1 }
0x192b   : > { %v1825_v24 = vadd.f32 %v1821_v23, %v3987_v22 }
0x192c   : > { %v3153_v25 = vpop.f32.mrf.mxu1 }
0x192d   : > { %3361 = vtanh.f32 %v1825_v24  ;;  %v2868_v27 = vmul.f32 -1.442695, %v1825_v24 }
0x192f   : > { %3363 = vpow2.f32 %v2868_v27 }
0x193a   : > { %v3362_v26 = vpop.eup %3361 }
0x193b   : > { %1835 = vrot.lane.b32.xlu0 %v3362_v26, %s4186_s0 }
0x193c   : > { %v3364_v28 = vpop.eup %3363 }
0x193d   : > { %v1829_v29 = vadd.f32 1.0, %v3364_v28 }
0x193f   : > { %3365 = vrcp.f32 %v1829_v29 }
0x194c   : > { %v3366_v30 = vpop.eup %3365 }
0x194d   : > { %v1833_v33 = vmul.f32 0.0, %v3366_v30 }
0x19ad   : > { %v1836_v31 = vpop.permute.xlu0 %1835 }
0x19ae   : > { %v1838_v32 = vmul.f32 %v3366_v30, %v1836_v31 }
0x19b0   : > { %1840 = vrot.lane.b32.xlu1 %v1838_v32, %s4188_s19 }
0x1a22   : > { %v1841_v3 = vpop.permute.xlu1 %1840 }
0x1a23   : > { %v1843_v34 = vadd.f32 %v1841_v3, %v1833_v33 }
0x1a25   : > { %3367 = vtanh.f32 %v1843_v34  ;;  %v1940_v50 = vrot.slane %v1843_v34, 7 }
0x1a32   : > { %v3368_v35 = vpop.eup %3367 }
0x1a33   : > { %1846 = vrot.lane.b32.xlu0 %v3368_v35, %s4186_s0 }
0x1aa5   : > { %v1847_v36 = vpop.permute.xlu0 %1846 }
0x1aa6   : > { %v1849_v37 = vmul.f32 %v3366_v30, %v1847_v36 }
0x1aa8   : > { %1851 = vrot.lane.b32.xlu1 %v1849_v37, %s4188_s19 }
0x1b1a   : > { %v1852_v38 = vpop.permute.xlu1 %1851 }
0x1b1b   : > { %1855 = vst.msk [vmem:[#allocation2] sm:$0x1] %vm1854_vm8, %v1852_v38  ;;  %3163 = vmatmul.mubr.msk.f32.vlgmr.msra.gmra.mxu0 %vm626_vm4, %v1852_v38 }
0x1b1c   : > { %3177 = vmatpush3.msra.mxu0 %v3933_v5  ;;  %3184 = vmatprep.mubr.msk.f32.mxu0 %vm3492_vm0, %v3491_v1 }
0x1b1d   : > { %3178 = vmatprep.subr.mxu0 %v3491_v1 }
0x1b1e   : > { %3179 = vmatpush3.msra.mxu0 %v3941_v6 }
0x1b1f   : > { %3180 = vmatprep.subr.mxu0 %v3491_v1 }
0x1b20   : > { %3181 = vmatpush3.msra.mxu0 %v3948_v9 }
0x1b21   : > { %3182 = vmatprep.subr.mxu0 %v3491_v1 }
0x1b22   : > { %3183 = vmatpush3.msra.mxu0 %v3955_v11 }
0x1b23   : > { %3198 = vmatprep.subr.mxu0 %v3491_v1 }
0x1bdb   : > { %v1924_v39 = vpop.f32.mrf.mxu0 }
0x1bdc   : > { %v1929_v40 = vrot.slane %v1924_v39, 7 }
0x1bdd   : > { %v3164_v41 = vpop.f32.mrf.mxu0 }
0x1bde   : > { %v1931_v42 = vadd.f32 %v1929_v40, %v3987_v22 }
0x1be0   : > { %3369 = vtanh.f32 %v1931_v42  ;;  %v2870_v44 = vmul.f32 -1.442695, %v1931_v42 }
0x1be2   : > { %3371 = vpow2.f32 %v2870_v44 }
0x1bed   : > { %v3370_v43 = vpop.eup %3369 }
0x1bee   : > { %1944 = vrot.lane.b32.xlu0 %v3370_v43, %s4186_s0 }
0x1bef   : > { %v3372_v45 = vpop.eup %3371 }
0x1bf0   : > { %v1935_v46 = vadd.f32 1.0, %v3372_v45 }
0x1bf2   : > { %3373 = vrcp.f32 %v1935_v46 }
0x1bff   : > { %v3374_v47 = vpop.eup %3373 }
0x1c00   : > { %v1942_v51 = vmul.f32 %v3374_v47, %v1940_v50 }
0x1c60   : > { %v1945_v48 = vpop.permute.xlu0 %1944 }
0x1c61   : > { %v1947_v49 = vmul.f32 %v3374_v47, %v1945_v48 }
0x1c63   : > { %1949 = vrot.lane.b32.xlu1 %v1947_v49, %s4188_s19 }
0x1cd5   : > { %v1950_v52 = vpop.permute.xlu1 %1949 }
0x1cd6   : > { %v1952_v53 = vadd.f32 %v1950_v52, %v1942_v51 }
0x1cd8   : > { %3375 = vtanh.f32 %v1952_v53  ;;  %v2052_v12 = vrot.slane %v1952_v53, 7 }
0x1ce5   : > { %v3376_v54 = vpop.eup %3375 }
0x1ce6   : > { %1955 = vrot.lane.b32.xlu0 %v3376_v54, %s4186_s0 }
0x1d58   : > { %v1956_v55 = vpop.permute.xlu0 %1955 }
0x1d59   : > { %v4009_v10 = vmul.f32 %v3374_v47, %v1956_v55 }
0x1d5b   : > { %v1965_v8 = vrot.slane %v4009_v10, 1 }
0x1d5d   : > { %1966 = vrot.lane.b32.xlu1 %v1965_v8, %s4188_s19 }
0x1dcf   : > { %v1967_v56 = vpop.permute.xlu1 %1966 }
0x1dd0   : > { %3174 = vmatmul.mubr.msk.f32.vlgmr.msra.gmra.mxu1 %vm626_vm4, %v1967_v56 }
0x1dd1   : > { %3188 = vmatpush3.msra.mxu1 %v3933_v5  ;;  %3195 = vmatprep.mubr.msk.f32.mxu1 %vm3492_vm0, %v3491_v1 }
0x1dd2   : > { %3189 = vmatprep.subr.mxu1 %v3491_v1 }
0x1dd3   : > { %3190 = vmatpush3.msra.mxu1 %v3941_v6 }
0x1dd4   : > { %3191 = vmatprep.subr.mxu1 %v3491_v1 }
0x1dd5   : > { %3192 = vmatpush3.msra.mxu1 %v3948_v9 }
0x1dd6   : > { %3193 = vmatprep.subr.mxu1 %v3491_v1 }
0x1dd7   : > { %3194 = vmatpush3.msra.mxu1 %v3955_v11 }
0x1dd8   : > { %3209 = vmatprep.subr.mxu1 %v3491_v1 }
0x1e90   : > { %v2036_v57 = vpop.f32.mrf.mxu1 }
0x1e91   : > { %v2041_v0 = vrot.slane %v2036_v57, 6 }
0x1e92   : > { %v3175_v7 = vpop.f32.mrf.mxu1 }
0x1e93   : > { %v2043_v58 = vadd.f32 %v2041_v0, %v3987_v22 }
0x1e95   : > { %3377 = vtanh.f32 %v2043_v58  ;;  %v2872_v60 = vmul.f32 -1.442695, %v2043_v58 }
0x1e97   : > { %3379 = vpow2.f32 %v2872_v60 }
0x1ea2   : > { %v3378_v59 = vpop.eup %3377 }
0x1ea3   : > { %2056 = vrot.lane.b32.xlu0 %v3378_v59, %s4186_s0 }
0x1ea4   : > { %v3380_v61 = vpop.eup %3379 }
0x1ea5   : > { %v2047_v2 = vadd.f32 1.0, %v3380_v61 }
0x1ea7   : > { %3381 = vrcp.f32 %v2047_v2 }
0x1eb4   : > { %v3382_v4 = vpop.eup %3381 }
0x1eb5   : > { %v2054_v13 = vmul.f32 %v3382_v4, %v2052_v12 }
0x1f15   : > { %v2057_v63 = vpop.permute.xlu0 %2056 }
0x1f16   : > { %v2059_v62 = vmul.f32 %v3382_v4, %v2057_v63 }
0x1f18   : > { %2061 = vrot.lane.b32.xlu1 %v2059_v62, %s4188_s19 }
0x1f8a   : > { %v2062_v14 = vpop.permute.xlu1 %2061 }
0x1f8b   : > { %v2064_v15 = vadd.f32 %v2062_v14, %v2054_v13 }
0x1f8d   : > { %3383 = vtanh.f32 %v2064_v15  ;;  %v2164_v33 = vrot.slane %v2064_v15, 7 }
0x1f9a   : > { %v3384_v16 = vpop.eup %3383 }
0x1f9b   : > { %2067 = vrot.lane.b32.xlu0 %v3384_v16, %s4186_s0 }
0x200d   : > { %v2068_v17 = vpop.permute.xlu0 %2067 }
0x200e   : > { %v4028_v18 = vmul.f32 %v3382_v4, %v2068_v17 }
0x2010   : > { %v2077_v19 = vrot.slane %v4028_v18, 2 }
0x2012   : > { %2078 = vrot.lane.b32.xlu1 %v2077_v19, %s4188_s19 }
0x2084   : > { %v2079_v20 = vpop.permute.xlu1 %2078 }
0x2085   : > { %3185 = vmatmul.mubr.msk.f32.vlgmr.msra.gmra.mxu0 %vm626_vm4, %v2079_v20 }
0x2086   : > { %3199 = vmatpush3.msra.mxu0 %v3933_v5  ;;  %3206 = vmatprep.mubr.msk.f32.mxu0 %vm3492_vm0, %v3491_v1 }
0x2087   : > { %3200 = vmatprep.subr.mxu0 %v3491_v1 }
0x2088   : > { %3201 = vmatpush3.msra.mxu0 %v3941_v6 }
0x2089   : > { %3202 = vmatprep.subr.mxu0 %v3491_v1 }
0x208a   : > { %3203 = vmatpush3.msra.mxu0 %v3948_v9 }
0x208b   : > { %3204 = vmatprep.subr.mxu0 %v3491_v1 }
0x208c   : > { %3205 = vmatpush3.msra.mxu0 %v3955_v11 }
0x208d   : > { %3220 = vmatprep.subr.mxu0 %v3491_v1 }
0x2145   : > { %v2148_v21 = vpop.f32.mrf.mxu0 }
0x2146   : > { %v2153_v23 = vrot.slane %v2148_v21, 5 }
0x2147   : > { %v3186_v24 = vpop.f32.mrf.mxu0 }
0x2148   : > { %v2155_v25 = vadd.f32 %v2153_v23, %v3987_v22 }
0x214a   : > { %3385 = vtanh.f32 %v2155_v25  ;;  %v2874_v27 = vmul.f32 -1.442695, %v2155_v25 }
0x214c   : > { %3387 = vpow2.f32 %v2874_v27 }
0x2157   : > { %v3386_v26 = vpop.eup %3385 }
0x2158   : > { %2168 = vrot.lane.b32.xlu0 %v3386_v26, %s4186_s0 }
0x2159   : > { %v3388_v28 = vpop.eup %3387 }
0x215a   : > { %v2159_v29 = vadd.f32 1.0, %v3388_v28 }
0x215c   : > { %3389 = vrcp.f32 %v2159_v29 }
0x2169   : > { %v3390_v30 = vpop.eup %3389 }
0x216a   : > { %v2166_v3 = vmul.f32 %v3390_v30, %v2164_v33 }
0x21ca   : > { %v2169_v31 = vpop.permute.xlu0 %2168 }
0x21cb   : > { %v2171_v32 = vmul.f32 %v3390_v30, %v2169_v31 }
0x21cd   : > { %2173 = vrot.lane.b32.xlu1 %v2171_v32, %s4188_s19 }
0x223f   : > { %v2174_v34 = vpop.permute.xlu1 %2173 }
0x2240   : > { %v2176_v35 = vadd.f32 %v2174_v34, %v2166_v3 }
0x2242   : > { %3391 = vtanh.f32 %v2176_v35  ;;  %v2276_v52 = vrot.slane %v2176_v35, 7 }
0x224f   : > { %v3392_v36 = vpop.eup %3391 }
0x2250   : > { %2179 = vrot.lane.b32.xlu0 %v3392_v36, %s4186_s0 }
0x22c2   : > { %v2180_v37 = vpop.permute.xlu0 %2179 }
0x22c3   : > { %v4047_v38 = vmul.f32 %v3390_v30, %v2180_v37 }
0x22c5   : > { %v2189_v39 = vrot.slane %v4047_v38, 3 }
0x22c7   : > { %2190 = vrot.lane.b32.xlu1 %v2189_v39, %s4188_s19 }
0x2339   : > { %v2191_v40 = vpop.permute.xlu1 %2190 }
0x233a   : > { %3196 = vmatmul.mubr.msk.f32.vlgmr.msra.gmra.mxu1 %vm626_vm4, %v2191_v40 }
0x233b   : > { %3210 = vmatpush3.msra.mxu1 %v3933_v5  ;;  %3217 = vmatprep.mubr.msk.f32.mxu1 %vm3492_vm0, %v3491_v1 }
0x233c   : > { %3211 = vmatprep.subr.mxu1 %v3491_v1 }
0x233d   : > { %3212 = vmatpush3.msra.mxu1 %v3941_v6 }
0x233e   : > { %3213 = vmatprep.subr.mxu1 %v3491_v1 }
0x233f   : > { %3214 = vmatpush3.msra.mxu1 %v3948_v9 }
0x2340   : > { %3215 = vmatprep.subr.mxu1 %v3491_v1 }
0x2341   : > { %3216 = vmatpush3.msra.mxu1 %v3955_v11 }
0x2342   : > { %3231 = vmatprep.subr.mxu1 %v3491_v1 }
0x23fa   : > { %v2260_v41 = vpop.f32.mrf.mxu1 }
0x23fb   : > { %v2265_v42 = vrot.slane %v2260_v41, 4 }
0x23fc   : > { %v3197_v43 = vpop.f32.mrf.mxu1 }
0x23fd   : > { %v2267_v44 = vadd.f32 %v2265_v42, %v3987_v22 }
0x23ff   : > { %3393 = vtanh.f32 %v2267_v44  ;;  %v2876_v46 = vmul.f32 -1.442695, %v2267_v44 }
0x2401   : > { %3395 = vpow2.f32 %v2876_v46 }
0x240c   : > { %v3394_v45 = vpop.eup %3393 }
0x240d   : > { %2280 = vrot.lane.b32.xlu0 %v3394_v45, %s4186_s0 }
0x240e   : > { %v3396_v47 = vpop.eup %3395 }
0x240f   : > { %v2271_v48 = vadd.f32 1.0, %v3396_v47 }
0x2411   : > { %3397 = vrcp.f32 %v2271_v48 }
0x241e   : > { %v3398_v49 = vpop.eup %3397 }
0x241f   : > { %v2278_v53 = vmul.f32 %v3398_v49, %v2276_v52 }
0x247f   : > { %v2281_v50 = vpop.permute.xlu0 %2280 }
0x2480   : > { %v2283_v51 = vmul.f32 %v3398_v49, %v2281_v50 }
0x2482   : > { %2285 = vrot.lane.b32.xlu1 %v2283_v51, %s4188_s19 }
0x24f4   : > { %v2286_v54 = vpop.permute.xlu1 %2285 }
0x24f5   : > { %v2288_v55 = vadd.f32 %v2286_v54, %v2278_v53 }
0x24f7   : > { %3399 = vtanh.f32 %v2288_v55 }
0x2504   : > { %v3400_v8 = vpop.eup %3399 }
0x2505   : > { %2291 = vrot.lane.b32.xlu0 %v3400_v8, %s4186_s0 }
0x2577   : > { %v2292_v56 = vpop.permute.xlu0 %2291 }
0x2578   : > { %v4066_v57 = vmul.f32 %v3398_v49, %v2292_v56 }
0x257a   : > { %v2301_v0 = vrot.slane %v4066_v57, 4 }
0x257c   : > { %2302 = vrot.lane.b32.xlu1 %v2301_v0, %s4188_s19 }
0x25ee   : > { %v2303_v7 = vpop.permute.xlu1 %2302 }
0x25ef   : > { %3207 = vmatmul.mubr.msk.f32.vlgmr.msra.gmra.mxu0 %vm626_vm4, %v2303_v7  ;;  %v2640_v7 = vld [vmem:[%s4172_s10 + $0x10] sm:$0xff] }
0x25f0   : > { %3221 = vmatpush3.msra.mxu0 %v3933_v5  ;;  %3228 = vmatprep.mubr.msk.f32.mxu0 %vm3492_vm0, %v3491_v1 }
0x25f1   : > { %3222 = vmatprep.subr.mxu0 %v3491_v1 }
0x25f2   : > { %3223 = vmatpush3.msra.mxu0 %v3941_v6 }
0x25f3   : > { %3224 = vmatprep.subr.mxu0 %v3491_v1 }
0x25f4   : > { %3225 = vmatpush3.msra.mxu0 %v3948_v9 }
0x25f5   : > { %3226 = vmatprep.subr.mxu0 %v3491_v1 }
0x25f6   : > { %3227 = vmatpush3.msra.mxu0 %v3955_v11  ;;  %v2388_v11 = vrot.slane %v2288_v55, 7 }
0x26af   : > { %v2372_v58 = vpop.f32.mrf.mxu0 }
0x26b0   : > { %v2377_v59 = vrot.slane %v2372_v58, 3 }
0x26b1   : > { %v3208_v60 = vpop.f32.mrf.mxu0 }
0x26b2   : > { %v2379_v5 = vadd.f32 %v2377_v59, %v3987_v22 }
0x26b4   : > { %3401 = vtanh.f32 %v2379_v5  ;;  %v2878_v2 = vmul.f32 -1.442695, %v2379_v5 }
0x26b6   : > { %3403 = vpow2.f32 %v2878_v2 }
0x26c1   : > { %v3402_v61 = vpop.eup %3401 }
0x26c2   : > { %2392 = vrot.lane.b32.xlu0 %v3402_v61, %s4186_s0 }
0x26c3   : > { %v3404_v6 = vpop.eup %3403 }
0x26c4   : > { %v2383_v4 = vadd.f32 1.0, %v3404_v6 }
0x26c6   : > { %3405 = vrcp.f32 %v2383_v4 }
0x26d3   : > { %v3406_v63 = vpop.eup %3405 }
0x26d4   : > { %v2390_v12 = vmul.f32 %v3406_v63, %v2388_v11 }
0x2734   : > { %v2393_v9 = vpop.permute.xlu0 %2392 }
0x2735   : > { %v2395_v62 = vmul.f32 %v3406_v63, %v2393_v9 }
0x2737   : > { %2397 = vrot.lane.b32.xlu1 %v2395_v62, %s4188_s19 }
0x27a9   : > { %v2398_v13 = vpop.permute.xlu1 %2397 }
0x27aa   : > { %v2400_v14 = vadd.f32 %v2398_v13, %v2390_v12 }
0x27ac   : > { %3407 = vtanh.f32 %v2400_v14  ;;  %v2500_v33 = vrot.slane %v2400_v14, 7 }
0x27b9   : > { %v3408_v15 = vpop.eup %3407 }
0x27ba   : > { %2403 = vrot.lane.b32.xlu0 %v3408_v15, %s4186_s0 }
0x282c   : > { %v2404_v16 = vpop.permute.xlu0 %2403 }
0x282d   : > { %v2406_v17 = vmul.f32 %v3406_v63, %v2404_v16 }
0x282f   : > { %v2413_v19 = vrot.slane %v2406_v17, 5 }
0x2831   : > { %2414 = vrot.lane.b32.xlu1 %v2413_v19, %s4188_s19 }
0x28a3   : > { %v2415_v20 = vpop.permute.xlu1 %2414 }
0x28a4   : > { %3218 = vmatmul.mubr.msk.f32.vlgmr.msra.gmra.mxu1 %vm626_vm4, %v2415_v20 }
0x28a5   : > { %3239 = vmatprep.mubr.msk.f32.mxu1 %vm3492_vm0, %v3491_v1  ;;  %vm1963_vm0 = vcmask 254977  }
0x2964   : > { %v2484_v21 = vpop.f32.mrf.mxu1 }
0x2965   : > { %v2489_v23 = vrot.slane %v2484_v21, 2 }
0x2966   : > { %v3219_v24 = vpop.f32.mrf.mxu1 }
0x2967   : > { %v2491_v25 = vadd.f32 %v2489_v23, %v3987_v22 }
0x2969   : > { %3409 = vtanh.f32 %v2491_v25  ;;  %v2880_v27 = vmul.f32 -1.442695, %v2491_v25 }
0x296b   : > { %3411 = vpow2.f32 %v2880_v27 }
0x2976   : > { %v3410_v26 = vpop.eup %3409 }
0x2977   : > { %2504 = vrot.lane.b32.xlu0 %v3410_v26, %s4186_s0 }
0x2978   : > { %v3412_v28 = vpop.eup %3411 }
0x2979   : > { %v2495_v29 = vadd.f32 1.0, %v3412_v28 }
0x297b   : > { %3413 = vrcp.f32 %v2495_v29 }
0x2988   : > { %v3414_v30 = vpop.eup %3413 }
0x2989   : > { %v2502_v3 = vmul.f32 %v3414_v30, %v2500_v33 }
0x29e9   : > { %v2505_v31 = vpop.permute.xlu0 %2504 }
0x29ea   : > { %v2507_v32 = vmul.f32 %v3414_v30, %v2505_v31 }
0x29ec   : > { %2509 = vrot.lane.b32.xlu1 %v2507_v32, %s4188_s19 }
0x2a5e   : > { %v2510_v34 = vpop.permute.xlu1 %2509 }
0x2a5f   : > { %v2512_v35 = vadd.f32 %v2510_v34, %v2502_v3 }
0x2a61   : > { %3415 = vtanh.f32 %v2512_v35 }
0x2a6e   : > { %v3416_v36 = vpop.eup %3415 }
0x2a6f   : > { %2515 = vrot.lane.b32.xlu0 %v3416_v36, %s4186_s0 }
0x2ae1   : > { %v2516_v37 = vpop.permute.xlu0 %2515 }
0x2ae2   : > { %v2518_v39 = vmul.f32 %v3414_v30, %v2516_v37 }
0x2ae4   : > { %v2525_v40 = vrot.slane %v2518_v39, 6 }
0x2ae6   : > { %2526 = vrot.lane.b32.xlu1 %v2525_v40, %s4188_s19 }
0x2b58   : > { %v2527_v41 = vpop.permute.xlu1 %2526 }
0x2b59   : > { %3229 = vmatmul.mubr.msk.f32.vlgmr.msra.gmra.mxu0 %vm626_vm4, %v2527_v41 }
0x2c19   : > { %v2596_v42 = vpop.f32.mrf.mxu0 }
0x2c1a   : > { %v2601_v43 = vrot.slane %v2596_v42, 1 }
0x2c1b   : > { %v3230_v44 = vpop.f32.mrf.mxu0 }
0x2c1c   : > { %v2603_v45 = vadd.f32 %v2601_v43, %v3987_v22  ;;  %v2612_v22 = vrot.slane %v2512_v35, 7 }
0x2c1e   : > { %3417 = vtanh.f32 %v2603_v45  ;;  %v2882_v47 = vmul.f32 -1.442695, %v2603_v45 }
0x2c20   : > { %3419 = vpow2.f32 %v2882_v47 }
0x2c2b   : > { %v3418_v46 = vpop.eup %3417 }
0x2c2c   : > { %2616 = vrot.lane.b32.xlu0 %v3418_v46, %s4186_s0 }
0x2c2d   : > { %v3420_v48 = vpop.eup %3419 }
0x2c2e   : > { %v2607_v49 = vadd.f32 1.0, %v3420_v48 }
0x2c30   : > { %3421 = vrcp.f32 %v2607_v49 }
0x2c3d   : > { %v3422_v50 = vpop.eup %3421 }
0x2c3e   : > { %v2614_v53 = vmul.f32 %v3422_v50, %v2612_v22 }
0x2c9e   : > { %v2617_v51 = vpop.permute.xlu0 %2616 }
0x2c9f   : > { %v2619_v52 = vmul.f32 %v3422_v50, %v2617_v51 }
0x2ca1   : > { %2621 = vrot.lane.b32.xlu1 %v2619_v52, %s4188_s19 }
0x2ca5   : > { %1960 = vrot.lane.b32.xlu1 %v4009_v10, %s4188_s19 }
0x2ca9   : > { %2184 = vrot.lane.b32.xlu1 %v4047_v38, %s4188_s19  ;;  %v2641_v38 = vld [vmem:[%s4172_s10 + $0x18] sm:$0xff] }
0x2caa   : > { %3232 = vmatpush3.msra.mxu1 %v2641_v38 }
0x2cab   : > { %3233 = vmatprep.subr.mxu1 %v3491_v1 }
0x2cac   : > { %3234 = vmatpush3.msra.mxu1 %v2640_v7 }
0x2cad   : > { %2408 = vrot.lane.b32.xlu1 %v2406_v17, %s4188_s19  ;;  %3235 = vmatprep.subr.mxu1 %v3491_v1 }
0x2d13   : > { %v2622_v54 = vpop.permute.xlu1 %2621 }
0x2d14   : > { %v2624_v55 = vadd.f32 %v2622_v54, %v2614_v53 }
0x2d16   : > { %3423 = vtanh.f32 %v2624_v55 }
0x2d17   : > { %v1961_v8 = vpop.permute.xlu1 %1960 }
0x2d18   : > { %1964 = vst.msk [vmem:[#allocation2] sm:$0x2] %vm1963_vm0, %v1961_v8 }
0x2d1b   : > { %v2185_v56 = vpop.permute.xlu1 %2184 }
0x2d1c   : > { %2188 = vst.msk [vmem:[#allocation2] sm:$0x8] %vm2187_vm9, %v2185_v56 }
0x2d1f   : > { %v2409_v0 = vpop.permute.xlu1 %2408 }
0x2d20   : > { %2412 = vst.msk [vmem:[#allocation2] sm:$0x20] %vm2411_vm10, %v2409_v0 }
0x2d23   : > { %v3424_v10 = vpop.eup %3423 }
0x2d24   : > { %2627 = vrot.lane.b32.xlu0 %v3424_v10, %s4186_s0 }
0x2d28   : > { %2072 = vrot.lane.b32.xlu0 %v4028_v18, %s4188_s19  ;;  %v2639_v18 = vld [vmem:[%s4172_s10 + $0x8] sm:$0xff] }
0x2d29   : > { %3236 = vmatpush3.msra.mxu1 %v2639_v18 }
0x2d2a   : > { %3237 = vmatprep.subr.mxu1 %v3491_v1  ;;  %v2883_v1 = vld [vmem:[%s4173_s11] ss:$0 sm:$0xff] }
0x2d2c   : > { %2296 = vrot.lane.b32.xlu0 %v4066_v57, %s4188_s19  ;;  %v2638_v57 = vld [vmem:[%s4172_s10] sm:$0xff] }
0x2d2d   : > { %3238 = vmatpush3.msra.mxu1 %v2638_v57 }
0x2d30   : > { %2520 = vrot.lane.b32.xlu0 %v2518_v39, %s4188_s19 }
0x2d96   : > { %v2628_v58 = vpop.permute.xlu0 %2627 }
0x2d97   : > { %v2630_v59 = vmul.f32 %v3422_v50, %v2628_v58 }
0x2d99   : > { %2632 = vrot.lane.b32.xlu1 %v2630_v59, %s4188_s19  ;;  %s432_s19 = sand.u32 1, %s3481_s22  }
0x2d9a   : > { %v2073_v60 = vpop.permute.xlu0 %2072  ;;  %s2834_s17 = sshll.u32 %s432_s19, 3  ;;  %s2734_s15 = scalar_lea.sflag [#allocation4], %s432_s19 }
0x2d9b   : > { %2076 = vst.msk [vmem:[#allocation2] sm:$0x4] %vm2075_vm11, %v2073_v60  ;;  %s434_s20 = scalar_lea.vmem [#allocation3], %s2834_s17 }
0x2d9c   : > { %s2747_s26 = sshll.u32 %s434_s20, 4  ;;  %s2748_s26 = int_to_ptr.vmem [resolvable:$true] %s2747_s26 }
0x2d9d   : > { %s3429_s29 = scalar_lea.vmem %s2748_s26, 128  ;;  %p3436_p0 = scmp.lt.s32.totalorder %s2748_s26, %s3434_s2 }
0x2d9e   : > { %v2297_v5 = vpop.permute.xlu0 %2296  ;;  %p3430_p11 = scmp.ne.s32.totalorder %s2748_s26, %s3429_s29  ;;  %p3437_p1 = scmp.lt.s32.totalorder %s3435_s25, %s3429_s29 }
0x2d9f   : > { %2300 = vst.msk [vmem:[#allocation2] sm:$0x10] %vm2299_vm12, %v2297_v5 }
0x2da0   : > { %p3431_p12 = pnand %p3430_p11, %p3600_p5  ;;  %p3438_p2 = por %p3437_p1, %p3436_p0 }
0x2da2   : > { %v2521_v61 = vpop.permute.xlu0 %2520  ;;  %p3432_p13 = pneg %p3431_p12 }
0x2da3   : > { %2524 = vst.msk [vmem:[#allocation2] sm:$0x40] %vm2523_vm13, %v2521_v61 }
0x2da4   : > { %p3439_p3 = pnand %p3438_p2, %p3432_p13 }
0x2e0b   : > { %v2633_v2 = vpop.permute.xlu1 %2632 }
0x2e0c   : > { %2636 = vst.msk [vmem:[#allocation2] sm:$0x80] %vm2635_vm14, %v2633_v2 }
0x2e13   : > { %v2637_v6 = vld [vmem:[#allocation2] sm:$0xff] }
0x2e14   : > { %3240 = vmatmul.mubr.msk.f32.vlgmr.msra.gmra.mxu1 %vm626_vm4, %v2637_v6 }
0x2ed4   : > { %v2718_v4 = vpop.f32.mrf.mxu1 }
0x2ed5   : > { %v2719_v63 = vadd.f32 %v2883_v1, %v2718_v4 }
0x2ed6   : > { %v3241_v9 = vpop.f32.mrf.mxu1 }
0x2ed7   : > { %2722 = vmax.xlane.f32.xlu0 %v2719_v63 }
0x2f60   : > { %v2723_v62 = vpop.xlane.xlu0 %2722 }
0x2f61   : > { %v2724_v11 = vsub.f32 %v2719_v63, %v2723_v62 }
0x2f63   : > { %v2725_v12 = vmul.f32 1.442695, %v2724_v11 }
0x2f65   : > { %3425 = vpow2.f32 %v2725_v12 }
0x2f72   : > { %v3426_v13 = vpop.eup %3425 }
0x2f73   : > { %2727 = vadd.xlane.f32.xlu1 %v3426_v13 }
0x2ffc   : > { %v2728_v14 = vpop.xlane.xlu1 %2727 }
0x2ffd   : > { %3427 = vlog2.f32 %v2728_v14 }
0x300a   : > { %v3428_v15 = vpop.eup %3427 }
0x300b   : > { %v2730_v16 = vmul.f32 0.6931472, %v3428_v15 }
0x300d   : > { %v2731_v17 = vsub.f32 %v2724_v11, %v2730_v16 }
0x300f   : > { %2732 = vst [vmem:[%s434_s20] sm:$0xff] %v2731_v17 }
0x3010   : > { %3442 = shalt.err (!%p3439_p3)
}
0x3011   : > { %s3443_s17 = scalar_lea.hbm %s2745_s1, 128  ;;  %s3447_s20 = scalar_lea.hbm %s4174_s12, 256 }
0x3012   : > { %p3444_p4 = scmp.ne.s32.totalorder %s2745_s1, %s3443_s17  ;;  %p3448_p9 = scmp.lt.s32.totalorder %s2745_s1, %s4174_s12 }
0x3013   : > { %p3449_p10 = scmp.lt.s32.totalorder %s3447_s20, %s3443_s17 }
0x3014   : > { %p3445_p7 = pnand %p3444_p4, %p3600_p5 }
0x3015   : > { %p3450_p11 = por %p3449_p10, %p3448_p9 }
0x3016   : > { %p3446_p8 = pneg %p3445_p7 }
0x3018   : > { %p3451_p12 = pnand %p3450_p11, %p3446_p8 }
0x301a   : > { %3454 = shalt.err (!%p3451_p12)
}
0x301b   : > { %3243 = dma.vmem_to_hbm [thread:$0]  (%p3600_p5), %s2748_s26, 128, %s2745_s1, %s2734_s15  }
0x301c PF: > { %p3249_p13 = scmp.ge.s32.totalorder %s3489_s24, 2  ;;  %s2759_s2 = sand.u32 1, %s3477_s21  }
0x301d   : > { %s2760_s29 = scalar_lea.sflag [#allocation4], %s2759_s2 }
0x301e   : > { %p3246_p0 = pnand %p3249_p13, %p3604_p6 }
0x3020   : > { %p3247_p1 = pneg %p3246_p0 }
0x3022   : > { %3472 = dma.done.wait (%p3247_p1), %s2760_s29, 128  }
0x3023   : > { %3474 = vsyncadd (%p3247_p1), %s2760_s29, 4294967168  ;;  %p22_p2 = scmp.ge.s32.totalorder %s3587_s27, 4   ;;  %s4189_s21 = smov %s3481_s22 }
0x3024   : > { %s4190_s22 = smov %s3485_s23  ;;  %s4191_s23 = smov %s3598_s30 }
0x3025   : > { %s4192_s24 = smov %s3587_s27  ;;  %24 = sbr.rel (!%p22_p2) target bundleno = 7 (0x7), region = 109 }
0x302a   :  { %2765 = vsyncpa [#allocation4], 1 }
0x302b   :  { %2767 = vsyncpa [#allocation4 + $0x1], 1 }

</bundles_post_ra>
